<compile_context>
chip_gen: v7x
topology: tpu7x:2x2x1
jax: 0.10.0
libtpu: 0.0.40
codegen_flags: <defaults>
</compile_context>

<pallas_src>
import jax
import jax.numpy as jnp
from jax import lax
from jax.experimental import pallas as pl
from jax.experimental.pallas import tpu as pltpu

EPS = 1e-5
LANE = 128
COMPUTE_DTYPE = jnp.bfloat16          # MXU input dtype; accumulation stays f32
VMEM_LIMIT_BYTES = 48 * 1024 * 1024   # headroom under v7x's 64 MiB per TC


def _round_up(v, m):
    return (v + m - 1) // m * m


def _im2col_3x3(xpad, H, W):
    """(H+2, W+2, Cp) -> (H*W, 9*Cp) patch matrix, tap-major / channel-minor."""
    Cp = xpad.shape[-1]
    cols = [xpad[di:di + H, dj:dj + W, :].reshape(H * W, Cp)
            for di in range(3) for dj in range(3)]
    return jnp.concatenate(cols, axis=-1)


# --------------- pass 1: conv1 + per-image BN1 partial statistics --------------
def _conv1_stats_kernel(xpad_ref, w_ref, ypad_ref, st_ref):
    _, Hp, Wp, Cp = xpad_ref.shape
    H, W = Hp - 2, Wp - 2
    xcol = _im2col_3x3(xpad_ref[0], H, W)                   # bf16 (H*W, 9*Cp)
    y = jnp.dot(xcol, w_ref[...],                           # single MXU contraction
                preferred_element_type=jnp.float32)         # f32 (H*W, Cp)

    # one-pass BN statistics for this image (finalized in the wrapper)
    st_ref[0:1, 0:1, :] = jnp.sum(y, axis=0, keepdims=True).reshape(1, 1, Cp)
    st_ref[0:1, 1:2, :] = jnp.sum(y * y, axis=0, keepdims=True).reshape(1, 1, Cp)

    # write conv1 output into a spatially padded buffer: zero ONLY the 1-wide
    # halo frame, then store the lane-dense interior.
    zrow = jnp.zeros((1, 1, Wp, Cp), jnp.float32)
    zcol = jnp.zeros((1, H, 1, Cp), jnp.float32)
    ypad_ref[0:1, 0:1, :, :] = zrow
    ypad_ref[0:1, H + 1:H + 2, :, :] = zrow
    ypad_ref[0:1, 1:H + 1, 0:1, :] = zcol
    ypad_ref[0:1, 1:H + 1, W + 1:W + 2, :] = zcol
    ypad_ref[0:1, 1:H + 1, 1:W + 1, :] = y.reshape(1, H, W, Cp)


# --------- pass 2: bn1 (folded) + relu + conv2 + per-image BN2 statistics ------
def _bn1_conv2_stats_kernel(ypad_ref, w_ref, sc_ref, sh_ref, y2_ref, st_ref):
    _, Hp, Wp, Cp = ypad_ref.shape
    H, W = Hp - 2, Wp - 2
    y1 = ypad_ref[0]                                        # f32 (Hp, Wp, Cp)
    h = jnp.maximum(y1 * sc_ref[...] + sh_ref[...], 0.0)    # bn1 + relu (f32 VPU)
    # bn maps the zero halo to a nonzero beta'; mask it back to zero so conv2's
    # implicit padding stays correct (vectorized select, no partial stores).
    r = lax.broadcasted_iota(jnp.int32, (Hp, Wp, Cp), 0)
    c = lax.broadcasted_iota(jnp.int32, (Hp, Wp, Cp), 1)
    interior = (r >= 1) & (r <= H) & (c >= 1) & (c <= W)
    hpad = jnp.where(interior, h, 0.0).astype(w_ref.dtype)  # bf16 for the MXU

    hcol = _im2col_3x3(hpad, H, W)
    y2 = jnp.dot(hcol, w_ref[...], preferred_element_type=jnp.float32)

    st_ref[0:1, 0:1, :] = jnp.sum(y2, axis=0, keepdims=True).reshape(1, 1, Cp)
    st_ref[0:1, 1:2, :] = jnp.sum(y2 * y2, axis=0, keepdims=True).reshape(1, 1, Cp)
    y2_ref[...] = y2.reshape(1, H, W, Cp)


# ------------------ pass 3: bn2 (folded) + residual + relu ---------------------
def _bn2_add_relu_kernel(y2_ref, xpad_ref, sc_ref, sh_ref, out_ref):
    _, H, W, Cp = y2_ref.shape
    res = xpad_ref[0][1:H + 1, 1:W + 1, :].astype(jnp.float32)  # residual = input
    o = y2_ref[...] * sc_ref[...] + sh_ref[...] + res
    out_ref[...] = jnp.maximum(o, 0.0)


def _fold_bn(stats, gamma_p, beta_p, count):
    """stats: (N, 2, Cp) per-image [sum, sumsq] -> folded BN scale/shift (1, Cp)."""
    s = jnp.sum(stats, axis=0)                              # (2, Cp)
    mean = s[0] / count
    var = jnp.maximum(s[1] / count - mean * mean, 0.0)      # biased variance
    inv = lax.rsqrt(var + EPS)
    scale = gamma_p * inv
    shift = beta_p - mean * scale
    return scale.reshape(1, -1), shift.reshape(1, -1)


@jax.jit
def basic_block(x_nchw, w1, w2, g1, b1, g2, b2):
    """x:(N,Cin,H,W); w1,w2:(C,C,3,3) OIHW; g*/b*: (C,) BN affine params."""
    N, C, H, W = x_nchw.shape
    Cout = w1.shape[0]
    assert C == Cout, "residual add requires inplanes == planes (stride=1)"
    Hp, Wp = H + 2, W + 2
    Cp = _round_up(max(C, LANE), LANE)        # lane-dense channel padding
    M = N * H * W

    # NHWC, channel pad -> Cp, +1 spatial halo, cast to MXU input dtype.
    x = jnp.transpose(x_nchw, (0, 2, 3, 1)).astype(jnp.float32)
    xpad = jnp.pad(x, ((0, 0), (1, 1), (1, 1), (0, Cp - C))).astype(COMPUTE_DTYPE)

    def pack_w(w):                            # OIHW -> (tap*Cin, Cout), zero-padded
        wt = jnp.transpose(w, (2, 3, 1, 0)).astype(jnp.float32)      # (3,3,Ci,Co)
        wt = jnp.pad(wt, ((0, 0), (0, 0), (0, Cp - C), (0, Cp - Cout)))
        return wt.reshape(9 * Cp, Cp).astype(COMPUTE_DTYPE)
    w1c, w2c = pack_w(w1), pack_w(w2)

    pad1 = lambda v: jnp.pad(v.astype(jnp.float32), (0, Cp - Cout))
    g1p, b1p, g2p, b2p = pad1(g1), pad1(b1), pad1(g2), pad1(b2)

    cparams = pltpu.CompilerParams(dimension_semantics=("parallel",),
                                   vmem_limit_bytes=VMEM_LIMIT_BYTES)
    conv_cost = pl.CostEstimate(
        flops=2 * M * 9 * Cp * Cp, transcendentals=0,
        bytes_accessed=int(N * Hp * Wp * Cp * 2 + 9 * Cp * Cp * 2
                           + N * Hp * Wp * Cp * 4 + N * 2 * Cp * 4))

    # ---- pass 1: conv1 + BN1 partial statistics (grid over batch) ----
    y1pad, st1 = pl.pallas_call(
        _conv1_stats_kernel,
        grid=(N,),
        in_specs=[pl.BlockSpec((1, Hp, Wp, Cp), lambda n: (n, 0, 0, 0)),
                  pl.BlockSpec((9 * Cp, Cp), lambda n: (0, 0))],
        out_specs=(pl.BlockSpec((1, Hp, Wp, Cp), lambda n: (n, 0, 0, 0)),
                   pl.BlockSpec((1, 2, Cp), lambda n: (n, 0, 0))),
        out_shape=(jax.ShapeDtypeStruct((N, Hp, Wp, Cp), jnp.float32),
                   jax.ShapeDtypeStruct((N, 2, Cp), jnp.float32)),
        compiler_params=cparams,
        cost_estimate=conv_cost,
    )(xpad, w1c)
    sc1, sh1 = _fold_bn(st1, g1p, b1p, M)

    # ---- pass 2: bn1 + relu + conv2 + BN2 partial statistics ----
    y2, st2 = pl.pallas_call(
        _bn1_conv2_stats_kernel,
        grid=(N,),
        in_specs=[pl.BlockSpec((1, Hp, Wp, Cp), lambda n: (n, 0, 0, 0)),
                  pl.BlockSpec((9 * Cp, Cp), lambda n: (0, 0)),
                  pl.BlockSpec((1, Cp), lambda n: (0, 0)),
                  pl.BlockSpec((1, Cp), lambda n: (0, 0))],
        out_specs=(pl.BlockSpec((1, H, W, Cp), lambda n: (n, 0, 0, 0)),
                   pl.BlockSpec((1, 2, Cp), lambda n: (n, 0, 0))),
        out_shape=(jax.ShapeDtypeStruct((N, H, W, Cp), jnp.float32),
                   jax.ShapeDtypeStruct((N, 2, Cp), jnp.float32)),
        compiler_params=cparams,
        cost_estimate=conv_cost,
    )(y1pad, w2c, sc1, sh1)
    sc2, sh2 = _fold_bn(st2, g2p, b2p, M)

    # ---- pass 3: bn2 + residual + relu (elementwise, lane-dense stores) ----
    out = pl.pallas_call(
        _bn2_add_relu_kernel,
        grid=(N,),
        in_specs=[pl.BlockSpec((1, H, W, Cp), lambda n: (n, 0, 0, 0)),
                  pl.BlockSpec((1, Hp, Wp, Cp), lambda n: (n, 0, 0, 0)),
                  pl.BlockSpec((1, Cp), lambda n: (0, 0)),
                  pl.BlockSpec((1, Cp), lambda n: (0, 0))],
        out_specs=pl.BlockSpec((1, H, W, Cp), lambda n: (n, 0, 0, 0)),
        out_shape=jax.ShapeDtypeStruct((N, H, W, Cp), jnp.float32),
        compiler_params=cparams,
    )(y2, xpad, sc2, sh2)

    out = out[..., :Cout]                       # drop channel padding
    return jnp.transpose(out, (0, 3, 1, 2))     # back to NCHW


def reference_forward(x, w1, w2, g1, b1, g2, b2):
    """Pure-JAX f32 reference mirroring the PyTorch forward (training-mode BN)."""
    conv = lambda a, w: lax.conv_general_dilated(
        a, w, (1, 1), [(1, 1), (1, 1)],
        dimension_numbers=('NCHW', 'OIHW', 'NCHW'))

    def bn(y, g, b):
        m = y.mean(axis=(0, 2, 3), keepdims=True)
        v = ((y - m) ** 2).mean(axis=(0, 2, 3), keepdims=True)
        return (y - m) * lax.rsqrt(v + EPS) * g.reshape(1, -1, 1, 1) + b.reshape(1, -1, 1, 1)

    h = jax.nn.relu(bn(conv(x, w1), g1, b1))
    o = bn(conv(h, w2), g2, b2) + x
    return jax.nn.relu(o)


if __name__ == "__main__":
    N, C, H, W = 2, 8, 8, 8        # inplanes = planes = 8, stride = 1
    key = jax.random.PRNGKey(0)
    kx, k1, k2 = jax.random.split(key, 3)

    x = jax.random.normal(kx, (N, C, H, W), jnp.float32)
    w1 = jax.random.normal(k1, (C, C, 3, 3), jnp.float32) * (2.0 / (C * 9)) ** 0.5
    w2 = jax.random.normal(k2, (C, C, 3, 3), jnp.float32) * (2.0 / (C * 9)) ** 0.5
    g1 = jnp.ones((C,), jnp.float32); b1 = jnp.zeros((C,), jnp.float32)
    g2 = jnp.ones((C,), jnp.float32); b2 = jnp.zeros((C,), jnp.float32)

    out = basic_block(x, w1, w2, g1, b1, g2, b2)
    out = jax.block_until_ready(out)

    ref = reference_forward(x, w1, w2, g1, b1, g2, b2)
    assert out.shape == ref.shape == (N, C, H, W)
    err = float(jnp.max(jnp.abs(out - ref)))
    # bf16 MXU inputs (f32 accumulation) -> small numerical delta vs f32 reference
    assert err < 5e-2, err

    print("KERNEL_OK")
</pallas_src>

<mosaic_0001>
module attributes {stable_mosaic.version = 11 : i64} {
  func.func @_conv1_stats_kernel(%arg0: i32, %arg1: memref<1x10x10x128xbf16, #tpu.memory_space<vmem>>, %arg2: memref<1152x128xbf16, #tpu.memory_space<vmem>>, %arg3: memref<1x10x10x128xf32, #tpu.memory_space<vmem>>, %arg4: memref<1x2x128xf32, #tpu.memory_space<vmem>>) attributes {dimension_semantics = [#tpu.dimension_semantics<parallel>], iteration_bounds = array<i64: 2>, scalar_prefetch = 0 : i64, scratch_operands = 0 : i64, tpu.core_type = #tpu.core_type<tc>, window_params = [{transform_indices = @transform_0, window_bounds = array<i64: 1, 10, 10, 128>}, {pipeline_mode = #tpu.pipeline_mode<synchronous>, transform_indices = @transform_1, window_bounds = array<i64: 1152, 128>}, {transform_indices = @transform_2, window_bounds = array<i64: 1, 10, 10, 128>}, {transform_indices = @transform_3, window_bounds = array<i64: 1, 2, 128>}]} {
    %c0 = arith.constant 0 : index
    %c0_0 = arith.constant 0 : index
    %c0_1 = arith.constant 0 : index
    %c0_2 = arith.constant 0 : index
    %0 = vector.load %arg1[%c0, %c0_0, %c0_1, %c0_2] : memref<1x10x10x128xbf16, #tpu.memory_space<vmem>>, vector<1x10x10x128xbf16>
    %1 = vector.shape_cast %0 : vector<1x10x10x128xbf16> to vector<10x10x128xbf16>
    %2 = vector.extract_strided_slice %1 {offsets = [0, 0, 0], sizes = [8, 8, 128], strides = [1, 1, 1]} : vector<10x10x128xbf16> to vector<8x8x128xbf16>
    %3 = vector.shape_cast %2 : vector<8x8x128xbf16> to vector<64x128xbf16>
    %4 = vector.extract_strided_slice %1 {offsets = [0, 1, 0], sizes = [8, 8, 128], strides = [1, 1, 1]} : vector<10x10x128xbf16> to vector<8x8x128xbf16>
    %5 = vector.shape_cast %4 : vector<8x8x128xbf16> to vector<64x128xbf16>
    %6 = vector.extract_strided_slice %1 {offsets = [0, 2, 0], sizes = [8, 8, 128], strides = [1, 1, 1]} : vector<10x10x128xbf16> to vector<8x8x128xbf16>
    %7 = vector.shape_cast %6 : vector<8x8x128xbf16> to vector<64x128xbf16>
    %8 = vector.extract_strided_slice %1 {offsets = [1, 0, 0], sizes = [8, 8, 128], strides = [1, 1, 1]} : vector<10x10x128xbf16> to vector<8x8x128xbf16>
    %9 = vector.shape_cast %8 : vector<8x8x128xbf16> to vector<64x128xbf16>
    %10 = vector.extract_strided_slice %1 {offsets = [1, 1, 0], sizes = [8, 8, 128], strides = [1, 1, 1]} : vector<10x10x128xbf16> to vector<8x8x128xbf16>
    %11 = vector.shape_cast %10 : vector<8x8x128xbf16> to vector<64x128xbf16>
    %12 = vector.extract_strided_slice %1 {offsets = [1, 2, 0], sizes = [8, 8, 128], strides = [1, 1, 1]} : vector<10x10x128xbf16> to vector<8x8x128xbf16>
    %13 = vector.shape_cast %12 : vector<8x8x128xbf16> to vector<64x128xbf16>
    %14 = vector.extract_strided_slice %1 {offsets = [2, 0, 0], sizes = [8, 8, 128], strides = [1, 1, 1]} : vector<10x10x128xbf16> to vector<8x8x128xbf16>
    %15 = vector.shape_cast %14 : vector<8x8x128xbf16> to vector<64x128xbf16>
    %16 = vector.extract_strided_slice %1 {offsets = [2, 1, 0], sizes = [8, 8, 128], strides = [1, 1, 1]} : vector<10x10x128xbf16> to vector<8x8x128xbf16>
    %17 = vector.shape_cast %16 : vector<8x8x128xbf16> to vector<64x128xbf16>
    %18 = vector.extract_strided_slice %1 {offsets = [2, 2, 0], sizes = [8, 8, 128], strides = [1, 1, 1]} : vector<10x10x128xbf16> to vector<8x8x128xbf16>
    %19 = vector.shape_cast %18 : vector<8x8x128xbf16> to vector<64x128xbf16>
    %20 = tpu.concatenate %3, %5, %7, %9, %11, %13, %15, %17, %19 in 1 : vector<64x128xbf16>, vector<64x128xbf16>, vector<64x128xbf16>, vector<64x128xbf16>, vector<64x128xbf16>, vector<64x128xbf16>, vector<64x128xbf16>, vector<64x128xbf16>, vector<64x128xbf16> -> vector<64x1152xbf16>
    %c0_3 = arith.constant 0 : index
    %c0_4 = arith.constant 0 : index
    %21 = vector.load %arg2[%c0_3, %c0_4] : memref<1152x128xbf16, #tpu.memory_space<vmem>>, vector<1152x128xbf16>
    %cst = arith.constant dense<0.000000e+00> : vector<64x128xf32>
    %22 = tpu.matmul %20, %21, %cst {dimension_numbers = #tpu.dot_dimension_numbers<[1], [0], [0], [1], [0, 0, 1, 1], [], []>} : vector<64x1152xbf16>, vector<1152x128xbf16>, vector<64x128xf32> -> vector<64x128xf32>
    %cst_5 = arith.constant dense<0.000000e+00> : vector<128xf32>
    %23 = vector.multi_reduction <add>, %22, %cst_5 [0] : vector<64x128xf32> to vector<128xf32>
    %24 = vector.shape_cast %23 : vector<128xf32> to vector<1x128xf32>
    %25 = vector.shape_cast %24 : vector<1x128xf32> to vector<1x1x128xf32>
    %c0_6 = arith.constant 0 : index
    %c0_7 = arith.constant 0 : index
    %c0_8 = arith.constant 0 : index
    %26 = vector.load %arg4[%c0_6, %c0_7, %c0_8] : memref<1x2x128xf32, #tpu.memory_space<vmem>>, vector<1x1x128xf32>
    tpu.vector_store %arg4[%c0_6, %c0_7, %c0_8], %25 {strides = array<i32>} : memref<1x2x128xf32, #tpu.memory_space<vmem>>, vector<1x1x128xf32>,
    %27 = arith.mulf %22, %22 : vector<64x128xf32>
    %cst_9 = arith.constant dense<0.000000e+00> : vector<128xf32>
    %28 = vector.multi_reduction <add>, %27, %cst_9 [0] : vector<64x128xf32> to vector<128xf32>
    %29 = vector.shape_cast %28 : vector<128xf32> to vector<1x128xf32>
    %30 = vector.shape_cast %29 : vector<1x128xf32> to vector<1x1x128xf32>
    %c0_10 = arith.constant 0 : index
    %c1 = arith.constant 1 : index
    %c0_11 = arith.constant 0 : index
    %31 = vector.load %arg4[%c0_10, %c1, %c0_11] : memref<1x2x128xf32, #tpu.memory_space<vmem>>, vector<1x1x128xf32>
    tpu.vector_store %arg4[%c0_10, %c1, %c0_11], %30 {strides = array<i32>} : memref<1x2x128xf32, #tpu.memory_space<vmem>>, vector<1x1x128xf32>,
    %cst_12 = arith.constant 0.000000e+00 : f32
    %32 = vector.broadcast %cst_12 : f32 to vector<1x1x10x128xf32>
    %cst_13 = arith.constant 0.000000e+00 : f32
    %33 = vector.broadcast %cst_13 : f32 to vector<1x8x1x128xf32>
    %c0_14 = arith.constant 0 : index
    %c0_15 = arith.constant 0 : index
    %c0_16 = arith.constant 0 : index
    %c0_17 = arith.constant 0 : index
    %34 = vector.load %arg3[%c0_14, %c0_15, %c0_16, %c0_17] : memref<1x10x10x128xf32, #tpu.memory_space<vmem>>, vector<1x1x10x128xf32>
    tpu.vector_store %arg3[%c0_14, %c0_15, %c0_16, %c0_17], %32 {strides = array<i32>} : memref<1x10x10x128xf32, #tpu.memory_space<vmem>>, vector<1x1x10x128xf32>,
    %c0_18 = arith.constant 0 : index
    %c9 = arith.constant 9 : index
    %c0_19 = arith.constant 0 : index
    %c0_20 = arith.constant 0 : index
    %35 = vector.load %arg3[%c0_18, %c9, %c0_19, %c0_20] : memref<1x10x10x128xf32, #tpu.memory_space<vmem>>, vector<1x1x10x128xf32>
    tpu.vector_store %arg3[%c0_18, %c9, %c0_19, %c0_20], %32 {strides = array<i32>} : memref<1x10x10x128xf32, #tpu.memory_space<vmem>>, vector<1x1x10x128xf32>,
    %c0_21 = arith.constant 0 : index
    %c1_22 = arith.constant 1 : index
    %c0_23 = arith.constant 0 : index
    %c0_24 = arith.constant 0 : index
    %36 = vector.load %arg3[%c0_21, %c1_22, %c0_23, %c0_24] : memref<1x10x10x128xf32, #tpu.memory_space<vmem>>, vector<1x8x1x128xf32>
    tpu.vector_store %arg3[%c0_21, %c1_22, %c0_23, %c0_24], %33 {strides = array<i32>} : memref<1x10x10x128xf32, #tpu.memory_space<vmem>>, vector<1x8x1x128xf32>,
    %c0_25 = arith.constant 0 : index
    %c1_26 = arith.constant 1 : index
    %c9_27 = arith.constant 9 : index
    %c0_28 = arith.constant 0 : index
    %37 = vector.load %arg3[%c0_25, %c1_26, %c9_27, %c0_28] : memref<1x10x10x128xf32, #tpu.memory_space<vmem>>, vector<1x8x1x128xf32>
    tpu.vector_store %arg3[%c0_25, %c1_26, %c9_27, %c0_28], %33 {strides = array<i32>} : memref<1x10x10x128xf32, #tpu.memory_space<vmem>>, vector<1x8x1x128xf32>,
    %38 = vector.shape_cast %22 : vector<64x128xf32> to vector<1x8x8x128xf32>
    %c0_29 = arith.constant 0 : index
    %c1_30 = arith.constant 1 : index
    %c1_31 = arith.constant 1 : index
    %c0_32 = arith.constant 0 : index
    %39 = vector.load %arg3[%c0_29, %c1_30, %c1_31, %c0_32] : memref<1x10x10x128xf32, #tpu.memory_space<vmem>>, vector<1x8x8x128xf32>
    tpu.vector_store %arg3[%c0_29, %c1_30, %c1_31, %c0_32], %38 {strides = array<i32>} : memref<1x10x10x128xf32, #tpu.memory_space<vmem>>, vector<1x8x8x128xf32>,
    return
  }
  func.func @transform_0(%arg0: i32) -> (i32, i32, i32, i32) {
    %c0_i32 = arith.constant 0 : i32
    %c0_i32_0 = arith.constant 0 : i32
    %c0_i32_1 = arith.constant 0 : i32
    %c0_i32_2 = arith.constant 0 : i32
    return %arg0, %c0_i32, %c0_i32_0, %c0_i32_1 : i32, i32, i32, i32
  }
  func.func @transform_1(%arg0: i32) -> (i32, i32) {
    %c0_i32 = arith.constant 0 : i32
    %c0_i32_0 = arith.constant 0 : i32
    %c0_i32_1 = arith.constant 0 : i32
    return %c0_i32, %c0_i32_0 : i32, i32
  }
  func.func @transform_2(%arg0: i32) -> (i32, i32, i32, i32) {
    %c0_i32 = arith.constant 0 : i32
    %c0_i32_0 = arith.constant 0 : i32
    %c0_i32_1 = arith.constant 0 : i32
    %c0_i32_2 = arith.constant 0 : i32
    return %arg0, %c0_i32, %c0_i32_0, %c0_i32_1 : i32, i32, i32, i32
  }
  func.func @transform_3(%arg0: i32) -> (i32, i32, i32) {
    %c0_i32 = arith.constant 0 : i32
    %c0_i32_0 = arith.constant 0 : i32
    %c0_i32_1 = arith.constant 0 : i32
    return %arg0, %c0_i32, %c0_i32_0 : i32, i32, i32
  }
}

module attributes {stable_mosaic.version = 11 : i64} {
  func.func @_bn1_conv2_stats_kernel(%arg0: i32, %arg1: memref<1x10x10x128xf32, #tpu.memory_space<vmem>>, %arg2: memref<1152x128xbf16, #tpu.memory_space<vmem>>, %arg3: memref<1x128xf32, #tpu.memory_space<vmem>>, %arg4: memref<1x128xf32, #tpu.memory_space<vmem>>, %arg5: memref<1x8x8x128xf32, #tpu.memory_space<vmem>>, %arg6: memref<1x2x128xf32, #tpu.memory_space<vmem>>) attributes {dimension_semantics = [#tpu.dimension_semantics<parallel>], iteration_bounds = array<i64: 2>, scalar_prefetch = 0 : i64, scratch_operands = 0 : i64, tpu.core_type = #tpu.core_type<tc>, window_params = [{transform_indices = @transform_0, window_bounds = array<i64: 1, 10, 10, 128>}, {pipeline_mode = #tpu.pipeline_mode<synchronous>, transform_indices = @transform_1, window_bounds = array<i64: 1152, 128>}, {pipeline_mode = #tpu.pipeline_mode<synchronous>, transform_indices = @transform_2, window_bounds = array<i64: 1, 128>}, {pipeline_mode = #tpu.pipeline_mode<synchronous>, transform_indices = @transform_3, window_bounds = array<i64: 1, 128>}, {transform_indices = @transform_4, window_bounds = array<i64: 1, 8, 8, 128>}, {transform_indices = @transform_5, window_bounds = array<i64: 1, 2, 128>}]} {
    %c0 = arith.constant 0 : index
    %c0_0 = arith.constant 0 : index
    %c0_1 = arith.constant 0 : index
    %c0_2 = arith.constant 0 : index
    %0 = vector.load %arg1[%c0, %c0_0, %c0_1, %c0_2] : memref<1x10x10x128xf32, #tpu.memory_space<vmem>>, vector<1x10x10x128xf32>
    %1 = vector.shape_cast %0 : vector<1x10x10x128xf32> to vector<10x10x128xf32>
    %c0_3 = arith.constant 0 : index
    %c0_4 = arith.constant 0 : index
    %2 = vector.load %arg3[%c0_3, %c0_4] : memref<1x128xf32, #tpu.memory_space<vmem>>, vector<1x128xf32>
    %3 = vector.shape_cast %2 : vector<1x128xf32> to vector<1x1x128xf32>
    %4 = vector.broadcast %3 : vector<1x1x128xf32> to vector<10x10x128xf32>
    %5 = arith.mulf %1, %4 : vector<10x10x128xf32>
    %c0_5 = arith.constant 0 : index
    %c0_6 = arith.constant 0 : index
    %6 = vector.load %arg4[%c0_5, %c0_6] : memref<1x128xf32, #tpu.memory_space<vmem>>, vector<1x128xf32>
    %7 = vector.shape_cast %6 : vector<1x128xf32> to vector<1x1x128xf32>
    %8 = vector.broadcast %7 : vector<1x1x128xf32> to vector<10x10x128xf32>
    %9 = arith.addf %5, %8 : vector<10x10x128xf32>
    %cst = arith.constant 0.000000e+00 : f32
    %10 = vector.broadcast %cst : f32 to vector<10x10x128xf32>
    %11 = arith.maximumf %9, %10 : vector<10x10x128xf32>
    %12 = tpu.iota {dimensions = array<i32: 0>} : vector<10x10x128xi32>
    %13 = tpu.iota {dimensions = array<i32: 1>} : vector<10x10x128xi32>
    %c1_i32 = arith.constant 1 : i32
    %14 = vector.broadcast %c1_i32 : i32 to vector<10x10x128xi32>
    %15 = arith.cmpi sge, %12, %14 : vector<10x10x128xi32>
    %c8_i32 = arith.constant 8 : i32
    %16 = vector.broadcast %c8_i32 : i32 to vector<10x10x128xi32>
    %17 = arith.cmpi sle, %12, %16 : vector<10x10x128xi32>
    %18 = arith.andi %15, %17 : vector<10x10x128xi1>
    %c1_i32_7 = arith.constant 1 : i32
    %19 = vector.broadcast %c1_i32_7 : i32 to vector<10x10x128xi32>
    %20 = arith.cmpi sge, %13, %19 : vector<10x10x128xi32>
    %21 = arith.andi %18, %20 : vector<10x10x128xi1>
    %c8_i32_8 = arith.constant 8 : i32
    %22 = vector.broadcast %c8_i32_8 : i32 to vector<10x10x128xi32>
    %23 = arith.cmpi sle, %13, %22 : vector<10x10x128xi32>
    %24 = arith.andi %21, %23 : vector<10x10x128xi1>
    %cst_9 = arith.constant 0.000000e+00 : f32
    %25 = vector.broadcast %cst_9 : f32 to vector<10x10x128xf32>
    %26 = arith.select %24, %11, %25 : vector<10x10x128xi1>, vector<10x10x128xf32>
    %27 = arith.truncf %26 : vector<10x10x128xf32> to vector<10x10x128xbf16>
    %28 = vector.extract_strided_slice %27 {offsets = [0, 0, 0], sizes = [8, 8, 128], strides = [1, 1, 1]} : vector<10x10x128xbf16> to vector<8x8x128xbf16>
    %29 = vector.shape_cast %28 : vector<8x8x128xbf16> to vector<64x128xbf16>
    %30 = vector.extract_strided_slice %27 {offsets = [0, 1, 0], sizes = [8, 8, 128], strides = [1, 1, 1]} : vector<10x10x128xbf16> to vector<8x8x128xbf16>
    %31 = vector.shape_cast %30 : vector<8x8x128xbf16> to vector<64x128xbf16>
    %32 = vector.extract_strided_slice %27 {offsets = [0, 2, 0], sizes = [8, 8, 128], strides = [1, 1, 1]} : vector<10x10x128xbf16> to vector<8x8x128xbf16>
    %33 = vector.shape_cast %32 : vector<8x8x128xbf16> to vector<64x128xbf16>
    %34 = vector.extract_strided_slice %27 {offsets = [1, 0, 0], sizes = [8, 8, 128], strides = [1, 1, 1]} : vector<10x10x128xbf16> to vector<8x8x128xbf16>
    %35 = vector.shape_cast %34 : vector<8x8x128xbf16> to vector<64x128xbf16>
    %36 = vector.extract_strided_slice %27 {offsets = [1, 1, 0], sizes = [8, 8, 128], strides = [1, 1, 1]} : vector<10x10x128xbf16> to vector<8x8x128xbf16>
    %37 = vector.shape_cast %36 : vector<8x8x128xbf16> to vector<64x128xbf16>
    %38 = vector.extract_strided_slice %27 {offsets = [1, 2, 0], sizes = [8, 8, 128], strides = [1, 1, 1]} : vector<10x10x128xbf16> to vector<8x8x128xbf16>
    %39 = vector.shape_cast %38 : vector<8x8x128xbf16> to vector<64x128xbf16>
    %40 = vector.extract_strided_slice %27 {offsets = [2, 0, 0], sizes = [8, 8, 128], strides = [1, 1, 1]} : vector<10x10x128xbf16> to vector<8x8x128xbf16>
    %41 = vector.shape_cast %40 : vector<8x8x128xbf16> to vector<64x128xbf16>
    %42 = vector.extract_strided_slice %27 {offsets = [2, 1, 0], sizes = [8, 8, 128], strides = [1, 1, 1]} : vector<10x10x128xbf16> to vector<8x8x128xbf16>
    %43 = vector.shape_cast %42 : vector<8x8x128xbf16> to vector<64x128xbf16>
    %44 = vector.extract_strided_slice %27 {offsets = [2, 2, 0], sizes = [8, 8, 128], strides = [1, 1, 1]} : vector<10x10x128xbf16> to vector<8x8x128xbf16>
    %45 = vector.shape_cast %44 : vector<8x8x128xbf16> to vector<64x128xbf16>
    %46 = tpu.concatenate %29, %31, %33, %35, %37, %39, %41, %43, %45 in 1 : vector<64x128xbf16>, vector<64x128xbf16>, vector<64x128xbf16>, vector<64x128xbf16>, vector<64x128xbf16>, vector<64x128xbf16>, vector<64x128xbf16>, vector<64x128xbf16>, vector<64x128xbf16> -> vector<64x1152xbf16>
    %c0_10 = arith.constant 0 : index
    %c0_11 = arith.constant 0 : index
    %47 = vector.load %arg2[%c0_10, %c0_11] : memref<1152x128xbf16, #tpu.memory_space<vmem>>, vector<1152x128xbf16>
    %cst_12 = arith.constant dense<0.000000e+00> : vector<64x128xf32>
    %48 = tpu.matmul %46, %47, %cst_12 {dimension_numbers = #tpu.dot_dimension_numbers<[1], [0], [0], [1], [0, 0, 1, 1], [], []>} : vector<64x1152xbf16>, vector<1152x128xbf16>, vector<64x128xf32> -> vector<64x128xf32>
    %cst_13 = arith.constant dense<0.000000e+00> : vector<128xf32>
    %49 = vector.multi_reduction <add>, %48, %cst_13 [0] : vector<64x128xf32> to vector<128xf32>
    %50 = vector.shape_cast %49 : vector<128xf32> to vector<1x128xf32>
    %51 = vector.shape_cast %50 : vector<1x128xf32> to vector<1x1x128xf32>
    %c0_14 = arith.constant 0 : index
    %c0_15 = arith.constant 0 : index
    %c0_16 = arith.constant 0 : index
    %52 = vector.load %arg6[%c0_14, %c0_15, %c0_16] : memref<1x2x128xf32, #tpu.memory_space<vmem>>, vector<1x1x128xf32>
    tpu.vector_store %arg6[%c0_14, %c0_15, %c0_16], %51 {strides = array<i32>} : memref<1x2x128xf32, #tpu.memory_space<vmem>>, vector<1x1x128xf32>,
    %53 = arith.mulf %48, %48 : vector<64x128xf32>
    %cst_17 = arith.constant dense<0.000000e+00> : vector<128xf32>
    %54 = vector.multi_reduction <add>, %53, %cst_17 [0] : vector<64x128xf32> to vector<128xf32>
    %55 = vector.shape_cast %54 : vector<128xf32> to vector<1x128xf32>
    %56 = vector.shape_cast %55 : vector<1x128xf32> to vector<1x1x128xf32>
    %c0_18 = arith.constant 0 : index
    %c1 = arith.constant 1 : index
    %c0_19 = arith.constant 0 : index
    %57 = vector.load %arg6[%c0_18, %c1, %c0_19] : memref<1x2x128xf32, #tpu.memory_space<vmem>>, vector<1x1x128xf32>
    tpu.vector_store %arg6[%c0_18, %c1, %c0_19], %56 {strides = array<i32>} : memref<1x2x128xf32, #tpu.memory_space<vmem>>, vector<1x1x128xf32>,
    %58 = vector.shape_cast %48 : vector<64x128xf32> to vector<1x8x8x128xf32>
    %c0_20 = arith.constant 0 : index
    %c0_21 = arith.constant 0 : index
    %c0_22 = arith.constant 0 : index
    %c0_23 = arith.constant 0 : index
    %59 = vector.load %arg5[%c0_20, %c0_21, %c0_22, %c0_23] : memref<1x8x8x128xf32, #tpu.memory_space<vmem>>, vector<1x8x8x128xf32>
    tpu.vector_store %arg5[%c0_20, %c0_21, %c0_22, %c0_23], %58 {strides = array<i32>} : memref<1x8x8x128xf32, #tpu.memory_space<vmem>>, vector<1x8x8x128xf32>,
    return
  }
  func.func @transform_0(%arg0: i32) -> (i32, i32, i32, i32) {
    %c0_i32 = arith.constant 0 : i32
    %c0_i32_0 = arith.constant 0 : i32
    %c0_i32_1 = arith.constant 0 : i32
    %c0_i32_2 = arith.constant 0 : i32
    return %arg0, %c0_i32, %c0_i32_0, %c0_i32_1 : i32, i32, i32, i32
  }
  func.func @transform_1(%arg0: i32) -> (i32, i32) {
    %c0_i32 = arith.constant 0 : i32
    %c0_i32_0 = arith.constant 0 : i32
    %c0_i32_1 = arith.constant 0 : i32
    return %c0_i32, %c0_i32_0 : i32, i32
  }
  func.func @transform_2(%arg0: i32) -> (i32, i32) {
    %c0_i32 = arith.constant 0 : i32
    %c0_i32_0 = arith.constant 0 : i32
    %c0_i32_1 = arith.constant 0 : i32
    return %c0_i32, %c0_i32_0 : i32, i32
  }
  func.func @transform_3(%arg0: i32) -> (i32, i32) {
    %c0_i32 = arith.constant 0 : i32
    %c0_i32_0 = arith.constant 0 : i32
    %c0_i32_1 = arith.constant 0 : i32
    return %c0_i32, %c0_i32_0 : i32, i32
  }
  func.func @transform_4(%arg0: i32) -> (i32, i32, i32, i32) {
    %c0_i32 = arith.constant 0 : i32
    %c0_i32_0 = arith.constant 0 : i32
    %c0_i32_1 = arith.constant 0 : i32
    %c0_i32_2 = arith.constant 0 : i32
    return %arg0, %c0_i32, %c0_i32_0, %c0_i32_1 : i32, i32, i32, i32
  }
  func.func @transform_5(%arg0: i32) -> (i32, i32, i32) {
    %c0_i32 = arith.constant 0 : i32
    %c0_i32_0 = arith.constant 0 : i32
    %c0_i32_1 = arith.constant 0 : i32
    return %arg0, %c0_i32, %c0_i32_0 : i32, i32, i32
  }
}

module attributes {stable_mosaic.version = 11 : i64} {
  func.func @_bn2_add_relu_kernel(%arg0: i32, %arg1: memref<1x8x8x128xf32, #tpu.memory_space<vmem>>, %arg2: memref<1x10x10x128xbf16, #tpu.memory_space<vmem>>, %arg3: memref<1x128xf32, #tpu.memory_space<vmem>>, %arg4: memref<1x128xf32, #tpu.memory_space<vmem>>, %arg5: memref<1x8x8x128xf32, #tpu.memory_space<vmem>>) attributes {dimension_semantics = [#tpu.dimension_semantics<parallel>], iteration_bounds = array<i64: 2>, scalar_prefetch = 0 : i64, scratch_operands = 0 : i64, tpu.core_type = #tpu.core_type<tc>, window_params = [{transform_indices = @transform_0, window_bounds = array<i64: 1, 8, 8, 128>}, {transform_indices = @transform_1, window_bounds = array<i64: 1, 10, 10, 128>}, {pipeline_mode = #tpu.pipeline_mode<synchronous>, transform_indices = @transform_2, window_bounds = array<i64: 1, 128>}, {pipeline_mode = #tpu.pipeline_mode<synchronous>, transform_indices = @transform_3, window_bounds = array<i64: 1, 128>}, {transform_indices = @transform_4, window_bounds = array<i64: 1, 8, 8, 128>}]} {
    %c0 = arith.constant 0 : index
    %c0_0 = arith.constant 0 : index
    %c0_1 = arith.constant 0 : index
    %c0_2 = arith.constant 0 : index
    %0 = vector.load %arg2[%c0, %c0_0, %c0_1, %c0_2] : memref<1x10x10x128xbf16, #tpu.memory_space<vmem>>, vector<1x10x10x128xbf16>
    %1 = vector.shape_cast %0 : vector<1x10x10x128xbf16> to vector<10x10x128xbf16>
    %2 = vector.extract_strided_slice %1 {offsets = [1, 1, 0], sizes = [8, 8, 128], strides = [1, 1, 1]} : vector<10x10x128xbf16> to vector<8x8x128xbf16>
    %3 = arith.extf %2 : vector<8x8x128xbf16> to vector<8x8x128xf32>
    %c0_3 = arith.constant 0 : index
    %c0_4 = arith.constant 0 : index
    %c0_5 = arith.constant 0 : index
    %c0_6 = arith.constant 0 : index
    %4 = vector.load %arg1[%c0_3, %c0_4, %c0_5, %c0_6] : memref<1x8x8x128xf32, #tpu.memory_space<vmem>>, vector<1x8x8x128xf32>
    %c0_7 = arith.constant 0 : index
    %c0_8 = arith.constant 0 : index
    %5 = vector.load %arg3[%c0_7, %c0_8] : memref<1x128xf32, #tpu.memory_space<vmem>>, vector<1x128xf32>
    %6 = vector.shape_cast %5 : vector<1x128xf32> to vector<1x1x1x128xf32>
    %7 = vector.broadcast %6 : vector<1x1x1x128xf32> to vector<1x8x8x128xf32>
    %8 = arith.mulf %4, %7 : vector<1x8x8x128xf32>
    %c0_9 = arith.constant 0 : index
    %c0_10 = arith.constant 0 : index
    %9 = vector.load %arg4[%c0_9, %c0_10] : memref<1x128xf32, #tpu.memory_space<vmem>>, vector<1x128xf32>
    %10 = vector.shape_cast %9 : vector<1x128xf32> to vector<1x1x1x128xf32>
    %11 = vector.broadcast %10 : vector<1x1x1x128xf32> to vector<1x8x8x128xf32>
    %12 = arith.addf %8, %11 : vector<1x8x8x128xf32>
    %13 = vector.shape_cast %3 : vector<8x8x128xf32> to vector<1x8x8x128xf32>
    %14 = arith.addf %12, %13 : vector<1x8x8x128xf32>
    %cst = arith.constant 0.000000e+00 : f32
    %15 = vector.broadcast %cst : f32 to vector<1x8x8x128xf32>
    %16 = arith.maximumf %14, %15 : vector<1x8x8x128xf32>
    %c0_11 = arith.constant 0 : index
    %c0_12 = arith.constant 0 : index
    %c0_13 = arith.constant 0 : index
    %c0_14 = arith.constant 0 : index
    %17 = vector.load %arg5[%c0_11, %c0_12, %c0_13, %c0_14] : memref<1x8x8x128xf32, #tpu.memory_space<vmem>>, vector<1x8x8x128xf32>
    tpu.vector_store %arg5[%c0_11, %c0_12, %c0_13, %c0_14], %16 {strides = array<i32>} : memref<1x8x8x128xf32, #tpu.memory_space<vmem>>, vector<1x8x8x128xf32>,
    return
  }
  func.func @transform_0(%arg0: i32) -> (i32, i32, i32, i32) {
    %c0_i32 = arith.constant 0 : i32
    %c0_i32_0 = arith.constant 0 : i32
    %c0_i32_1 = arith.constant 0 : i32
    %c0_i32_2 = arith.constant 0 : i32
    return %arg0, %c0_i32, %c0_i32_0, %c0_i32_1 : i32, i32, i32, i32
  }
  func.func @transform_1(%arg0: i32) -> (i32, i32, i32, i32) {
    %c0_i32 = arith.constant 0 : i32
    %c0_i32_0 = arith.constant 0 : i32
    %c0_i32_1 = arith.constant 0 : i32
    %c0_i32_2 = arith.constant 0 : i32
    return %arg0, %c0_i32, %c0_i32_0, %c0_i32_1 : i32, i32, i32, i32
  }
  func.func @transform_2(%arg0: i32) -> (i32, i32) {
    %c0_i32 = arith.constant 0 : i32
    %c0_i32_0 = arith.constant 0 : i32
    %c0_i32_1 = arith.constant 0 : i32
    return %c0_i32, %c0_i32_0 : i32, i32
  }
  func.func @transform_3(%arg0: i32) -> (i32, i32) {
    %c0_i32 = arith.constant 0 : i32
    %c0_i32_0 = arith.constant 0 : i32
    %c0_i32_1 = arith.constant 0 : i32
    return %c0_i32, %c0_i32_0 : i32, i32
  }
  func.func @transform_4(%arg0: i32) -> (i32, i32, i32, i32) {
    %c0_i32 = arith.constant 0 : i32
    %c0_i32_0 = arith.constant 0 : i32
    %c0_i32_1 = arith.constant 0 : i32
    %c0_i32_2 = arith.constant 0 : i32
    return %arg0, %c0_i32, %c0_i32_0, %c0_i32_1 : i32, i32, i32, i32
  }
}

</mosaic_0001>

<bundles_post_ra>
// kernel: basic_block.5
= control target key start
LH: loop header
LB: loop body
LE: loop exit
PB: predicated region body
PF: predicated region fallthrough
CT: control target
= control target key end

     0   :  { %s486_s15 = smov 0   ;;  %s582_s0 = inlined_call_operand.vmem [shape: f32[2,8,8,128], index: 0, kind: input, shape index: {}]   ;;  %s583_s1 = inlined_call_operand.vmem [shape: bf16[2,10,10,128], index: 1, kind: input, shape index: {}]   ;;  %s584_s2 = inlined_call_operand.vmem [shape: f32[1,128], index: 2, kind: input, shape index: {}]   ;;  %s585_s3 = inlined_call_operand.vmem [shape: f32[1,128], index: 3, kind: input, shape index: {}]   ;;  %s586_s4 = inlined_call_operand.vmem [shape: f32[2,8,8,128], index: 4, kind: output, shape index: {}]  }
   0x1 LB: > { %s428_s16 = sadd.s32 4294967295, %s459_s15   ;;  %p432_p0 = scmp.ge.s32.totalorder %s459_s15, 1  ;;  %s459_s15 = sphi %s486_s15, %s14_s15  }
   0x2   : > { %p172_p1 = scmp.lt.s32.totalorder %s459_s15, 3 }
   0x4   : > { %p173_p2 = pnand %p432_p0, %p172_p1 }
   0x5   : > { %p203_p3 = scmp.lt.s32.totalorder (!%p173_p2), %s428_s16, 1  ;;  %v501_v0 = vld [vmem:[%s584_s2] ss:$0 sm:$0xff] (!%p173_p2)  ;;  %vm304_vm0 = vcmask (!%p173_p2), 1046528  }
   0x6   : > { %176 = sbr.rel (%p173_p2) target bundleno = 41 (0x29), region = 36  ;;  %v513_v1 = vld [vmem:[%s585_s3] ss:$0 sm:$0xff] (!%p173_p2) }
   0xd   : > { %s588_s16 = smov (!%p203_p3, %s428_s16), 1 }
   0xe   : > { %s442_s17 = sshll.u32 %s588_s16, 6  ;;  %s444_s18 = smul.u32 80, %s588_s16 }
   0xf   : > { %s508_s23 = scalar_lea.vmem %s582_s0, %s442_s17  ;;  %s548_s5 = scalar_lea.vmem %s586_s4, %s442_s17 }
  0x10   : > { %s518_s28 = scalar_lea.vmem %s583_s1, %s444_s18  ;;  %v250_v2 = vld [vmem:[%s508_s23] sm:$0xff]  ;;  %v251_v3 = vld [vmem:[%s508_s23 + $0x8] sm:$0xff]  ;;  %v252_v4 = vld [vmem:[%s508_s23 + $0x10] sm:$0xff] }
  0x11   : > { %v218_v5 = vld [vmem:[%s518_s28 + $0x8] ss:$8 sps:$4 sm:$0xff]   ;;  %v219_v6 = vld [vmem:[%s518_s28 + $0xc] sm:$0x1]  ;;  %v265_v7 = vmul.f32 %v501_v0, %v250_v2  ;;  %v221_v8 = vld [vmem:[%s518_s28 + $0x14] sm:$0x1]  ;;  %v266_v9 = vmul.f32 %v501_v0, %v251_v3  ;;  %v267_v10 = vmul.f32 %v501_v0, %v252_v4 }
  0x12   : > { %v234_v11 = vunpack.c.l.bf16 %v218_v5  ;;  %v235_v12 = vunpack.c.l.bf16 %v219_v6  ;;  %v236_v13 = vunpack.c.h.bf16 %v218_v5  ;;  %v237_v14 = vunpack.c.l.bf16 %v221_v8  ;;  %v222_v15 = vld [vmem:[%s518_s28 + $0x18] ss:$8 sps:$4 sm:$0xff]   ;;  %v223_v16 = vld [vmem:[%s518_s28 + $0x1c] sm:$0x1]  ;;  %v225_v21 = vld [vmem:[%s518_s28 + $0x24] sm:$0x1] }
  0x13   : > { %v280_v17 = vadd.f32 %v513_v1, %v265_v7  ;;  %v281_v18 = vadd.f32 %v513_v1, %v266_v9  ;;  %v238_v19 = vunpack.c.l.bf16 %v222_v15  ;;  %v239_v20 = vunpack.c.l.bf16 %v223_v16  ;;  %v253_v22 = vld [vmem:[%s508_s23 + $0x18] sm:$0xff]  ;;  %v226_v31 = vld [vmem:[%s518_s28 + $0x28] ss:$8 sps:$4 sm:$0xff]   ;;  %v227_v36 = vld [vmem:[%s518_s28 + $0x2c] sm:$0x1] }
  0x14   : > { %v305_v23 = vrot.slane %v234_v11, 1  ;;  %v306_v24 = vrot.slane %v235_v12, 1  ;;  %v308_v25 = vrot.slane %v236_v13, 1  ;;  %v309_v26 = vrot.slane %v237_v14, 1  ;;  %v254_v37 = vld [vmem:[%s508_s23 + $0x20] sm:$0xff]  ;;  %v255_v47 = vld [vmem:[%s508_s23 + $0x28] sm:$0xff] }
  0x15   : > { %v282_v27 = vadd.f32 %v513_v1, %v267_v10  ;;  %v311_v28 = vrot.slane %v238_v19, 1  ;;  %v312_v29 = vrot.slane %v239_v20, 1  ;;  %v240_v30 = vunpack.c.h.bf16 %v222_v15  ;;  %v229_v46 = vld [vmem:[%s518_s28 + $0x34] sm:$0x1]  ;;  %v230_v52 = vld [vmem:[%s518_s28 + $0x38] ss:$8 sps:$4 sm:$0xff]  }
  0x16   : > { %v307_v32 = vsel %vm304_vm0, %v305_v23, %v306_v24  ;;  %v310_v33 = vsel %vm304_vm0, %v308_v25, %v309_v26  ;;  %v241_v34 = vunpack.c.l.bf16 %v225_v21  ;;  %v268_v35 = vmul.f32 %v501_v0, %v253_v22  ;;  %v231_v53 = vld [vmem:[%s518_s28 + $0x3c] sm:$0x1]  ;;  %v256_v58 = vld [vmem:[%s508_s23 + $0x30] sm:$0xff]  ;;  %v233_v5 = vld [vmem:[%s518_s28 + $0x44] sm:$0x1] }
  0x17   : > { %v337_v38 = vadd.f32 %v307_v32, %v280_v17  ;;  %v338_v39 = vadd.f32 %v310_v33, %v281_v18  ;;  %v313_v40 = vsel %vm304_vm0, %v311_v28, %v312_v29  ;;  %v314_v41 = vrot.slane %v240_v30, 1  ;;  %v257_v10 = vld [vmem:[%s508_s23 + $0x38] sm:$0xff] }
  0x18   : > { %v339_v42 = vadd.f32 %v313_v40, %v282_v27  ;;  %v283_v43 = vadd.f32 %v513_v1, %v268_v35  ;;  %v315_v44 = vrot.slane %v241_v34, 1  ;;  %v242_v45 = vunpack.c.l.bf16 %v226_v31 }
  0x19   : > { %v345_v48 = vmax.f32 %v337_v38, 0.0  ;;  %v346_v49 = vmax.f32 %v338_v39, 0.0  ;;  %v243_v50 = vunpack.c.l.bf16 %v227_v36  ;;  %v269_v51 = vmul.f32 %v501_v0, %v254_v37 }
  0x1a   : > { %v347_v54 = vmax.f32 %v339_v42, 0.0  ;;  %v316_v55 = vsel %vm304_vm0, %v314_v41, %v315_v44  ;;  %v317_v56 = vrot.slane %v242_v45, 1  ;;  %v244_v57 = vunpack.c.h.bf16 %v226_v31 }
  0x1b   : > { %353 = vst [vmem:[%s548_s5] sm:$0xff] %v345_v48  ;;  %354 = vst [vmem:[%s548_s5 + $0x8] sm:$0xff] %v346_v49  ;;  %v340_v59 = vadd.f32 %v316_v55, %v283_v43  ;;  %v284_v60 = vadd.f32 %v513_v1, %v269_v51  ;;  %v318_v61 = vrot.slane %v243_v50, 1  ;;  %v245_v62 = vunpack.c.l.bf16 %v229_v46 }
  0x1c   : > { %355 = vst [vmem:[%s548_s5 + $0x10] sm:$0xff] %v347_v54  ;;  %v270_v63 = vmul.f32 %v501_v0, %v255_v47  ;;  %v320_v2 = vrot.slane %v244_v57, 1  ;;  %v246_v3 = vunpack.c.l.bf16 %v230_v52  ;;  %v247_v4 = vunpack.c.l.bf16 %v231_v53 }
  0x1d   : > { %v348_v6 = vmax.f32 %v340_v59, 0.0  ;;  %v319_v7 = vsel %vm304_vm0, %v317_v56, %v318_v61  ;;  %v321_v8 = vrot.slane %v245_v62, 1  ;;  %v271_v9 = vmul.f32 %v501_v0, %v256_v58 }
  0x1e   : > { %v341_v11 = vadd.f32 %v319_v7, %v284_v60  ;;  %v285_v12 = vadd.f32 %v513_v1, %v270_v63  ;;  %v323_v13 = vrot.slane %v246_v3, 1  ;;  %v324_v14 = vrot.slane %v247_v4, 1 }
  0x1f   : > { %356 = vst [vmem:[%s548_s5 + $0x18] sm:$0xff] %v348_v6  ;;  %v322_v15 = vsel %vm304_vm0, %v320_v2, %v321_v8  ;;  %v286_v16 = vadd.f32 %v513_v1, %v271_v9  ;;  %v248_v17 = vunpack.c.h.bf16 %v230_v52  ;;  %v249_v18 = vunpack.c.l.bf16 %v233_v5 }
  0x20   : > { %v349_v19 = vmax.f32 %v341_v11, 0.0  ;;  %v342_v20 = vadd.f32 %v322_v15, %v285_v12  ;;  %v325_v21 = vsel %vm304_vm0, %v323_v13, %v324_v14  ;;  %v272_v22 = vmul.f32 %v501_v0, %v257_v10 }
  0x21   : > { %v343_v23 = vadd.f32 %v325_v21, %v286_v16  ;;  %v326_v24 = vrot.slane %v248_v17, 1  ;;  %v327_v25 = vrot.slane %v249_v18, 1 }
  0x22   : > { %357 = vst [vmem:[%s548_s5 + $0x20] sm:$0xff] %v349_v19  ;;  %v350_v26 = vmax.f32 %v342_v20, 0.0  ;;  %v287_v27 = vadd.f32 %v513_v1, %v272_v22 }
  0x23   : > { %v351_v28 = vmax.f32 %v343_v23, 0.0  ;;  %v328_v29 = vsel %vm304_vm0, %v326_v24, %v327_v25 }
  0x24   : > { %358 = vst [vmem:[%s548_s5 + $0x28] sm:$0xff] %v350_v26  ;;  %v344_v30 = vadd.f32 %v328_v29, %v287_v27 }
  0x25   : > { %359 = vst [vmem:[%s548_s5 + $0x30] sm:$0xff] %v351_v28 }
  0x26   : > { %v352_v31 = vmax.f32 %v344_v30, 0.0 }
  0x28   : > { %360 = vst [vmem:[%s548_s5 + $0x38] sm:$0xff] %v352_v31 }
  0x29 PF: > { %s14_s15 = sadd.s32 1, %s459_s15  }
  0x2a   : > { %p11_p4 = scmp.ge.s32.totalorder %s14_s15, 4  }
  0x2c   :  { %13 = sbr.rel (!%p11_p4) target bundleno = 1 (0x1), region = 69 }

// kernel: basic_block.4
= control target key start
LH: loop header
LB: loop body
LE: loop exit
PB: predicated region body
PF: predicated region fallthrough
CT: control target
= control target key end

     0   :  { %s2246_s18 = smov 0   ;;  %s2876_s0 = inlined_call_operand.vmem [shape: f32[2,10,10,128], index: 0, kind: input, shape index: {}]   ;;  %s2877_s1 = inlined_call_operand.vmem [shape: bf16[1152,128], index: 1, kind: input, shape index: {}]   ;;  %s2878_s2 = inlined_call_operand.vmem [shape: f32[1,128], index: 2, kind: input, shape index: {}]   ;;  %s2879_s3 = inlined_call_operand.vmem [shape: f32[1,128], index: 3, kind: input, shape index: {}]   ;;  %s2880_s4 = inlined_call_operand.vmem [shape: f32[2,8,8,128], index: 4, kind: output, shape index: {0}]   ;;  %s2881_s5 = inlined_call_operand.vmem [shape: f32[2,2,128], index: 5, kind: output, shape index: {1}]  }
   0x1 LB: > { %s1717_s19 = sadd.s32 4294967295, %s2213_s18   ;;  %p1721_p0 = scmp.ge.s32.totalorder %s2213_s18, 1  ;;  %s2213_s18 = sphi %s2246_s18, %s16_s18  }
   0x2   : > { %p190_p1 = scmp.lt.s32.totalorder %s2213_s18, 3 }
   0x4   : > { %p191_p2 = pnand %p1721_p0, %p190_p1 }
   0x5   : > { %v2135_v0 = vld [vmem:[%s2877_s1 + $0x40] sm:$0xff] (!%p191_p2)   ;;  %v2139_v4 = vld [vmem:[%s2877_s1 + $0x48] sm:$0xff] (!%p191_p2)   ;;  %v2143_v8 = vld [vmem:[%s2877_s1 + $0x50] sm:$0xff] (!%p191_p2)   ;;  %p222_p3 = scmp.lt.s32.totalorder (!%p191_p2), %s1717_s19, 1  ;;  %v331_v23 = vlaneseq (!%p191_p2)  ;;  %v2215_v27 = vmov (!%p191_p2), 0.0|0.0   ;;  %vm531_vm2 = vcmask (!%p191_p2), 1042432  }
   0x6   : > { %194 = sbr.rel (%p191_p2) target bundleno = 365 (0x16d), region = 36  ;;  %v2136_v1 = vld [vmem:[%s2877_s1 + $0xc0] sm:$0xff] (!%p191_p2)   ;;  %1913 = vmatprep.subr.bf16.mxu0 (!%p191_p2), %v2135_v0  ;;  %v2140_v5 = vld [vmem:[%s2877_s1 + $0xc8] sm:$0xff] (!%p191_p2)   ;;  %v2144_v9 = vld [vmem:[%s2877_s1 + $0xd0] sm:$0xff] (!%p191_p2)   ;;  %v2341_v28 = vcombine.low (!%p191_p2), %v2215_v27, %v2215_v27  ;;  %v2378_v42 = vcombine.high (!%p191_p2), %v2215_v27, %v2215_v27  ;;  %vm532_vm3 = vcmask (!%p191_p2), 1046532  }
   0x7   : > { %v2137_v2 = vld [vmem:[%s2877_s1] sm:$0xff] (!%p191_p2)   ;;  %1953 = vmatprep.subr.bf16.mxu1 (!%p191_p2), %v2136_v1  ;;  %v2141_v6 = vld [vmem:[%s2877_s1 + $0x8] sm:$0xff] (!%p191_p2)   ;;  %v2145_v10 = vld [vmem:[%s2877_s1 + $0x10] sm:$0xff] (!%p191_p2)   ;;  %v2346_v30 = vshrl.u32 (!%p191_p2), %v331_v23, 7  ;;  %vm416_vm4 = vsmask.f32 (!%p191_p2), 3328 }
   0x8   : > { %v2138_v3 = vld [vmem:[%s2877_s1 + $0x80] sm:$0xff] (!%p191_p2)   ;;  %1914 = vmatpush3.bf16.msra.mxu0 (!%p191_p2), %v2137_v2  ;;  %v2142_v7 = vld [vmem:[%s2877_s1 + $0x88] sm:$0xff] (!%p191_p2)   ;;  %v2146_v11 = vld [vmem:[%s2877_s1 + $0x90] sm:$0xff] (!%p191_p2)   ;;  %v420_v35 = vshrl.u32 (!%p191_p2), %v2341_v28, 16  ;;  %v423_v37 = vshll.u32 (!%p191_p2), %v2341_v28, 16  ;;  %v429_v52 = vshll.u32 (!%p191_p2), %v2378_v42, 16 }
   0x9   : > { %1954 = vmatpush3.bf16.msra.mxu1 (!%p191_p2), %v2138_v3  ;;  %1915 = vmatprep.subr.bf16.mxu0 (!%p191_p2), %v2139_v4  ;;  %v2147_v12 = vld [vmem:[%s2877_s1 + $0x58] sm:$0xff] (!%p191_p2)   ;;  %v2151_v16 = vld [vmem:[%s2877_s1 + $0x60] sm:$0xff] (!%p191_p2)   ;;  %v2155_v20 = vld [vmem:[%s2877_s1 + $0x68] sm:$0xff] (!%p191_p2)   ;;  %v2355_v33 = vadd.s32 (!%p191_p2), 8, %v2346_v30  ;;  %vm334_vm0 = vcmp.ge.s32.totalorder (!%p191_p2), %v2346_v30, 1  ;;  %v1744_v2 = vrot.slane (!%p191_p2), %v2341_v28, 9 }
   0xa   : > { %1955 = vmatprep.subr.bf16.mxu1 (!%p191_p2), %v2140_v5  ;;  %v2148_v13 = vld [vmem:[%s2877_s1 + $0xd8] sm:$0xff] (!%p191_p2)   ;;  %v2152_v17 = vld [vmem:[%s2877_s1 + $0xe0] sm:$0xff] (!%p191_p2)   ;;  %v2156_v21 = vld [vmem:[%s2877_s1 + $0xe8] sm:$0xff] (!%p191_p2)   ;;  %v422_v46 = vrot.slane (!%p191_p2), %v420_v35, 4  ;;  %v425_v47 = vrot.slane (!%p191_p2), %v423_v37, 5  ;;  %v536_v3 = vrot.slane (!%p191_p2), %v2378_v42, 5 }
   0xb   : > { %v2149_v14 = vld [vmem:[%s2877_s1 + $0x18] sm:$0xff] (!%p191_p2)   ;;  %v2153_v18 = vld [vmem:[%s2877_s1 + $0x20] sm:$0xff] (!%p191_p2)   ;;  %v2157_v22 = vld [vmem:[%s2877_s1 + $0x28] sm:$0xff] (!%p191_p2)   ;;  %vm341_vm1 = vcmp.le.s32.totalorder (!%p191_p2), %v2355_v33, 8  ;;  %vm417_vm5 = vsmask.f32 (!%p191_p2), 7440 }
   0xc   : > { %1916 = vmatpush3.bf16.msra.mxu0 (!%p191_p2), %v2141_v6  ;;  %v2150_v15 = vld [vmem:[%s2877_s1 + $0x98] sm:$0xff] (!%p191_p2)   ;;  %v2154_v19 = vld [vmem:[%s2877_s1 + $0xa0] sm:$0xff] (!%p191_p2)   ;;  %v2158_v24 = vld [vmem:[%s2877_s1 + $0xa8] sm:$0xff] (!%p191_p2)   ;;  %v426_v1 = vor.u32 (!%p191_p2), %v425_v47, %v422_v46 }
   0xd   : > { %1956 = vmatpush3.bf16.msra.mxu1 %v2142_v7  ;;  %1917 = vmatprep.subr.bf16.mxu0 %v2143_v8  ;;  %s2889_s19 = smov (!%p222_p3, %s1717_s19), 1  ;;  %v2159_v25 = vld [vmem:[%s2877_s1 + $0x70] sm:$0xff]   ;;  %v2163_v32 = vld [vmem:[%s2877_s1 + $0x78] sm:$0xff]   ;;  %v2386_v44 = vld [vmem:[%s2878_s2] ss:$0 sm:$0xff] }
   0xe   : > { %1957 = vmatprep.subr.bf16.mxu1 %v2144_v9  ;;  %v2160_v26 = vld [vmem:[%s2877_s1 + $0xf0] sm:$0xff]   ;;  %s2125_s26 = smul.u32 160, %s2889_s19  ;;  %v2164_v34 = vld [vmem:[%s2877_s1 + $0xf8] sm:$0xff]   ;;  %v2391_v45 = vld [vmem:[%s2879_s3] ss:$0 sm:$0xff]  ;;  %s1859_s10 = sshll.u32 %s2889_s19, 6 }
   0xf   : > { %v2161_v29 = vld [vmem:[%s2877_s1 + $0x30] sm:$0xff]   ;;  %v2165_v36 = vld [vmem:[%s2877_s1 + $0x38] sm:$0xff]   ;;  %v2167_v53 = vld [vmem:[%s2877_s1 + $0x140] sm:$0xff]   ;;  %s2856_s14 = scalar_lea.vmem %s2880_s4, %s1859_s10  ;;  %s1725_s15 = sshll.u32 %s2889_s19, 1 }
  0x10   : > { %1918 = vmatpush3.bf16.msra.mxu0 %v2145_v10  ;;  %v2162_v31 = vld [vmem:[%s2877_s1 + $0xb0] sm:$0xff]   ;;  %s2363_s12 = scalar_lea.vmem %s2876_s0, %s2125_s26  ;;  %v2166_v38 = vld [vmem:[%s2877_s1 + $0xb8] sm:$0xff]   ;;  %v2168_v59 = vld [vmem:[%s2877_s1 + $0x1c0] sm:$0xff]   ;;  %s235_s20 = scalar_lea.vmem %s2881_s5, %s1725_s15 }
  0x11   : > { %1958 = vmatpush3.bf16.msra.mxu1 %v2146_v11  ;;  %1919 = vmatprep.subr.bf16.mxu0 %v2147_v12  ;;  %v239_v39 = vld [vmem:[%s2363_s12 + $0x10] sm:$0xff]  ;;  %v240_v40 = vld [vmem:[%s2363_s12 + $0x18] sm:$0x3]  ;;  %v241_v41 = vld [vmem:[%s2363_s12 + $0x20] sm:$0xff] }
  0x12   : > { %1959 = vmatprep.subr.bf16.mxu1 %v2148_v13  ;;  %v242_v43 = vld [vmem:[%s2363_s12 + $0x28] sm:$0x3]  ;;  %v266_v48 = vmul.f32 %v2386_v44, %v239_v39  ;;  %v267_v49 = vmul.f32 %v2386_v44, %v240_v40  ;;  %v268_v50 = vmul.f32 %v2386_v44, %v241_v41  ;;  %v253_v54 = vld [vmem:[%s2363_s12 + $0x80] sm:$0xff]  ;;  %vm2432_vm6 = vmpackc.low %vm334_vm0, %vm334_vm0 }
  0x13   : > { %v269_v51 = vmul.f32 %v2386_v44, %v242_v43  ;;  %v254_v60 = vld [vmem:[%s2363_s12 + $0x88] sm:$0x3]  ;;  %v280_v8 = vmul.f32 %v2386_v44, %v253_v54  ;;  %vm2441_vm7 = vmor %vm531_vm2, %vm532_vm3  ;;  %v244_v40 = vld [vmem:[%s2363_s12 + $0x38] sm:$0x3] }
  0x14   : > { %1920 = vmatpush3.bf16.msra.mxu0 %v2149_v14  ;;  %v293_v55 = vadd.f32 %v2391_v45, %v266_v48  ;;  %v294_v56 = vadd.f32 %v2391_v45, %v267_v49  ;;  %v295_v57 = vadd.f32 %v2391_v45, %v268_v50  ;;  %v281_v9 = vmul.f32 %v2386_v44, %v254_v60  ;;  %vm2456_vm8 = vmor %vm416_vm4, %vm417_vm5  ;;  %v245_v41 = vld [vmem:[%s2363_s12 + $0x40] sm:$0xff] }
  0x15   : > { %1960 = vmatpush3.bf16.msra.mxu1 %v2150_v15  ;;  %1921 = vmatprep.subr.bf16.mxu0 %v2151_v16  ;;  %v296_v58 = vadd.f32 %v2391_v45, %v269_v51  ;;  %v2463_v39 = vsel %vm2441_vm7, %v1744_v2, %v536_v3  ;;  %v2169_v54 = vld [vmem:[%s2877_s1 + $0x100] sm:$0xff]   ;;  %v2174_v3 = vld [vmem:[%s2877_s1 + $0x188] sm:$0xff]  }
  0x16   : > { %1961 = vmatprep.subr.bf16.mxu1 %v2152_v17  ;;  %v313_v61 = vmax.f32 %v293_v55, 0.0  ;;  %v314_v62 = vmax.f32 %v294_v56, 0.0  ;;  %v2410_v63 = vmax.f32 %v295_v57, 0.0  ;;  %v2170_v55 = vld [vmem:[%s2877_s1 + $0x180] sm:$0xff]   ;;  %v271_v56 = vmul.f32 %v2386_v44, %v244_v40  ;;  %v2177_v40 = vld [vmem:[%s2877_s1 + $0x110] sm:$0xff]  }
  0x17   : > { %v316_v0 = vmax.f32 %v296_v58, 0.0 }
  0x18   : > { %1922 = vmatpush3.bf16.msra.mxu0 %v2153_v18  ;;  %v348_v4 = vsel %vm334_vm0, %v313_v61, 0.0  ;;  %v349_v5 = vsel %vm341_vm1, %v314_v62, 0.0  ;;  %v350_v6 = vsel %vm334_vm0, %v2410_v63, 0.0  ;;  %v1893_v18 = vpack.c.bf16 %v2410_v63, %v313_v61  ;;  %v2171_v61 = vld [vmem:[%s2877_s1 + $0x148] sm:$0xff]  }
  0x19   : > { %1962 = vmatpush3.bf16.msra.mxu1 %v2154_v19  ;;  %1923 = vmatprep.subr.bf16.mxu0 %v2155_v20  ;;  %v351_v7 = vsel %vm341_vm1, %v316_v0, 0.0  ;;  %v1860_v10 = vpack.c.bf16 %v348_v4, %v348_v4  ;;  %v1861_v11 = vpack.c.bf16 %v349_v5, %v349_v5  ;;  %v2425_v12 = vpack.c.bf16 %v350_v6, %v350_v6  ;;  %v2172_v62 = vld [vmem:[%s2877_s1 + $0x1c8] sm:$0xff]  }
  0x1a   : > { %1963 = vmatprep.subr.bf16.mxu1 %v2156_v21  ;;  %v2427_v13 = vpack.c.bf16 %v351_v7, %v351_v7  ;;  %v427_v19 = vrot.slane %v426_v1, 4  ;;  %v431_v20 = vrot.slane %v429_v52, 5  ;;  %1894 = vmatprep.mubr.msk.bf16.mxu1 %vm2432_vm6, %v1893_v18  ;;  %v272_v0 = vmul.f32 %v2386_v44, %v245_v41  ;;  %v2180_v41 = vld [vmem:[%s2877_s1 + $0x1d8] sm:$0xff]  }
  0x1b   : > { %v434_v15 = vshrl.u32 %v1860_v10, 16  ;;  %v437_v16 = vshll.u32 %v1860_v10, 16  ;;  %v443_v17 = vshll.u32 %v1861_v11, 16  ;;  %v448_v21 = vshrl.u32 %v2425_v12, 16 }
  0x1c   : > { %1924 = vmatpush3.bf16.msra.mxu0 %v2157_v22  ;;  %v451_v22 = vshll.u32 %v2425_v12, 16  ;;  %v457_v35 = vshll.u32 %v2427_v13, 16  ;;  %v1745_v43 = vrot.slane %v1860_v10, 9  ;;  %v540_v46 = vrot.slane %v1861_v11, 5 }
  0x1d   : > { %1964 = vmatpush3.bf16.msra.mxu1 %v2158_v24  ;;  %1925 = vmatprep.subr.bf16.mxu0 %v2159_v25  ;;  %v2446_v24 = vadd.f32 %v2391_v45, %v280_v8  ;;  %v2449_v25 = vadd.f32 %v2391_v45, %v281_v9  ;;  %v439_v28 = vrot.slane %v437_v16, 5  ;;  %v445_v37 = vrot.slane %v443_v17, 5  ;;  %v2176_v8 = vld [vmem:[%s2877_s1 + $0x1d0] sm:$0xff]   ;;  %v2173_v9 = vld [vmem:[%s2877_s1 + $0x108] sm:$0xff]  }
  0x1e   : > { %1965 = vmatprep.subr.bf16.mxu1 %v2160_v26  ;;  %v436_v26 = vrot.slane %v434_v15, 4  ;;  %v2472_v50 = vsel %vm2456_vm8, %v427_v19, %v431_v20  ;;  %v459_v52 = vrot.slane %v457_v35, 5  ;;  %v299_v6 = vadd.f32 %v2391_v45, %v272_v0  ;;  %v2175_v20 = vld [vmem:[%s2877_s1 + $0x150] sm:$0xff]  }
  0x1f   : > { %v327_v48 = vmax.f32 %v2446_v24, 0.0  ;;  %v328_v49 = vmax.f32 %v2449_v25, 0.0  ;;  %v1746_v7 = vrot.slane %v2425_v12, 9  ;;  %v544_v16 = vrot.slane %v2427_v13, 5  ;;  %v2178_v13 = vld [vmem:[%s2877_s1 + $0x190] sm:$0xff]  }
  0x20   : > { %1926 = vmatpush3.bf16.msra.mxu0 %v2161_v29  ;;  %v243_v29 = vld [vmem:[%s2363_s12 + $0x30] sm:$0xff]  ;;  %v2519_v15 = vmax.f32 %v299_v6, 0.0 }
  0x21   : > { %1966 = vmatpush3.bf16.msra.mxu1 %v2162_v31  ;;  %1927 = vmatprep.subr.bf16.mxu0 %v2163_v32  ;;  %v450_v32 = vrot.slane %v448_v21, 4  ;;  %v270_v47 = vmul.f32 %v2386_v44, %v243_v29  ;;  %v2526_v17 = vsel %vm334_vm0, %v327_v48, 0.0  ;;  %v246_v21 = vld [vmem:[%s2363_s12 + $0x48] sm:$0x3]  ;;  %v2731_v30 = vsel %vm341_vm1, %v328_v49, 0.0 }
  0x22   : > { %1967 = vmatprep.subr.bf16.mxu1 %v2164_v34  ;;  %v453_v34 = vrot.slane %v451_v22, 5  ;;  %v354_v29 = vsel %vm334_vm0, %v2519_v15, 0.0  ;;  %v2204_v31 = vld [vmem:[%s2877_s1 + $0x228] sm:$0xff]  }
  0x23   : > { %v297_v57 = vadd.f32 %v2391_v45, %v270_v47  ;;  %v2546_v35 = vpack.c.bf16 %v354_v29, %v354_v29 }
  0x24   : > { %1928 = vmatpush3.bf16.msra.mxu0 %v2165_v36  ;;  %v440_v36 = vor.u32 %v439_v28, %v436_v26  ;;  %v454_v42 = vor.u32 %v453_v34, %v450_v32  ;;  %v247_v32 = vld [vmem:[%s2363_s12 + $0x50] sm:$0xff]  ;;  %v248_v34 = vld [vmem:[%s2363_s12 + $0x58] sm:$0x3] }
  0x25   : > { %1968 = vmatpush3.bf16.msra.mxu1 %v2166_v38  ;;  %1993 = vmatprep.subr.bf16.mxu0 %v2167_v53  ;;  %v367_v38 = vpack.c.bf16 %v349_v5, %v348_v4  ;;  %v2476_v53 = vsel %vm2441_vm7, %v1745_v43, %v540_v46  ;;  %v298_v4 = vadd.f32 %v2391_v45, %v271_v56  ;;  %v2506_v5 = vmax.f32 %v297_v57, 0.0  ;;  %v249_v56 = vld [vmem:[%s2363_s12 + $0x60] sm:$0xff] }
  0x26   : > { %2033 = vmatprep.subr.bf16.mxu1 %v2168_v59  ;;  %v441_v51 = vrot.slane %v440_v36, 4  ;;  %v1766_v60 = vcombine.low %v2463_v39, %v2476_v53  ;;  %v455_v1 = vrot.slane %v454_v42, 4  ;;  %v479_v0 = vshll.u32 %v2546_v35, 16 }
  0x27   : > { %v1758_v59 = vcombine.low %v2215_v27, %v367_v38  ;;  %v318_v10 = vmax.f32 %v298_v4, 0.0  ;;  %v352_v11 = vsel %vm334_vm0, %v2506_v5, 0.0  ;;  %v1896_v36 = vpack.c.bf16 %v2519_v15, %v2506_v5 }
  0x28   : > { %v2488_v58 = vsel %vm2456_vm8, %v441_v51, %v445_v37  ;;  %1360 = vmatmul.mubr.bf16.vlgmr.msra.gmra.mrb[0].mxu1 %v1766_v60  ;;  %v1864_v12 = vpack.c.bf16 %v352_v11, %v352_v11  ;;  %v2530_v18 = vsel %vm2456_vm8, %v455_v1, %v459_v52  ;;  %v2552_v37 = vsel %vm2441_vm7, %v1746_v7, %v544_v16 }
  0x29   : > { %v1762_v2 = vcombine.low %v2472_v50, %v2488_v58  ;;  %2034 = vmatpush3.bf16.msra.mxu1 %v2170_v55  ;;  %v353_v19 = vsel %vm341_vm1, %v318_v10, 0.0  ;;  %1897 = vmatprep.mubr.msk.bf16.mxu1 %vm2432_vm6, %v1896_v36  ;;  %v273_v51 = vmul.f32 %v2386_v44, %v246_v21  ;;  %v274_v52 = vmul.f32 %v2386_v44, %v247_v32  ;;  %v2184_v10 = vld [vmem:[%s2877_s1 + $0x1e0] sm:$0xff]  }
  0x2a   : > { %2035 = vmatprep.subr.bf16.mxu1 %v2172_v62  ;;  %v1865_v22 = vpack.c.bf16 %v353_v19, %v353_v19  ;;  %v462_v26 = vshrl.u32 %v1864_v12, 16  ;;  %v465_v28 = vshll.u32 %v1864_v12, 16  ;;  %v1747_v38 = vrot.slane %v1864_v12, 9  ;;  %v2182_v62 = vld [vmem:[%s2877_s1 + $0x198] sm:$0xff]  }
  0x2b   : > { %1294 = vmatprep.mubr.bf16.mxu0 %v1762_v2  ;;  %v476_v55 = vshrl.u32 %v2546_v35, 16  ;;  %v300_v2 = vadd.f32 %v2391_v45, %v273_v51  ;;  %v2591_v11 = vpack.c.bf16 %v2506_v5, %v2410_v63  ;;  %v2181_v12 = vld [vmem:[%s2877_s1 + $0x118] sm:$0xff]   ;;  %v1748_v5 = vrot.slane %v2546_v35, 9  ;;  %v2186_v35 = vld [vmem:[%s2877_s1 + $0x1a0] sm:$0xff]   ;;  %v250_v51 = vld [vmem:[%s2363_s12 + $0x68] sm:$0x3] }
  0x2c   : > { %1295 = vmatmul.mubr.bf16.vlgmr.msra.gmra.mrb[0].mxu0 %v1758_v59  ;;  %v464_v42 = vrot.slane %v462_v26, 4  ;;  %v467_v43 = vrot.slane %v465_v28, 5  ;;  %v471_v46 = vshll.u32 %v1865_v22, 16  ;;  %v548_v47 = vrot.slane %v1865_v22, 5  ;;  %v2183_v22 = vld [vmem:[%s2877_s1 + $0x160] sm:$0xff]  }
  0x2d   : > { %1994 = vmatpush3.bf16.msra.mxu0 %v2169_v54  ;;  %2036 = vmatpush3.bf16.msra.mxu1 %v2174_v3  ;;  %v275_v54 = vmul.f32 %v2386_v44, %v248_v34  ;;  %v301_v3 = vadd.f32 %v2391_v45, %v274_v52  ;;  %v478_v7 = vrot.slane %v476_v55, 4  ;;  %v320_v16 = vmax.f32 %v300_v2, 0.0  ;;  %v2185_v34 = vld [vmem:[%s2877_s1 + $0x120] sm:$0xff]   ;;  %v252_v52 = vld [vmem:[%s2363_s12 + $0x78] sm:$0x3]  ;;  %v2189_v2 = vld [vmem:[%s2877_s1 + $0x128] sm:$0xff]  }
  0x2e   : > { %1995 = vmatprep.subr.bf16.mxu0 %v2171_v61  ;;  %2037 = vmatprep.subr.bf16.mxu1 %v2176_v8  ;;  %v468_v57 = vor.u32 %v467_v43, %v464_v42  ;;  %v473_v59 = vrot.slane %v471_v46, 5  ;;  %v2569_v60 = vsel %vm2441_vm7, %v1747_v38, %v548_v47  ;;  %v2179_v61 = vld [vmem:[%s2877_s1 + $0x158] sm:$0xff]   ;;  %v481_v8 = vrot.slane %v479_v0, 5  ;;  %v2187_v42 = vld [vmem:[%s2877_s1 + $0x168] sm:$0xff]  }
  0x2f   : > { %v2580_v1 = vcombine.low %v2552_v37, %v2569_v60  ;;  %v302_v4 = vadd.f32 %v2391_v45, %v275_v54  ;;  %v2597_v19 = vmax.f32 %v301_v3, 0.0  ;;  %v355_v28 = vsel %vm341_vm1, %v320_v16, 0.0  ;;  %v2188_v43 = vld [vmem:[%s2877_s1 + $0x1e8] sm:$0xff]   ;;  %v251_v3 = vld [vmem:[%s2363_s12 + $0x70] sm:$0xff] }
  0x30   : > { %v469_v6 = vrot.slane %v468_v57, 4  ;;  %v482_v21 = vor.u32 %v481_v8, %v478_v7  ;;  %v1867_v36 = vpack.c.bf16 %v355_v28, %v355_v28  ;;  %v2190_v47 = vld [vmem:[%s2877_s1 + $0x1a8] sm:$0xff]   ;;  %v277_v16 = vmul.f32 %v2386_v44, %v250_v51 }
  0x31   : > { %1996 = vmatpush3.bf16.msra.mxu0 %v2173_v9  ;;  %2038 = vmatpush3.bf16.msra.mxu1 %v2178_v13  ;;  %v276_v9 = vmul.f32 %v2386_v44, %v249_v56  ;;  %v356_v29 = vsel %vm334_vm0, %v2597_v19, 0.0  ;;  %v279_v28 = vmul.f32 %v2386_v44, %v252_v52  ;;  %v1778_v23 = vcombine.low %v2476_v53, %v2552_v37 }
  0x32   : > { %1997 = vmatprep.subr.bf16.mxu0 %v2175_v20  ;;  %2039 = vmatprep.subr.bf16.mxu1 %v2180_v41  ;;  %v322_v20 = vmax.f32 %v302_v4, 0.0  ;;  %v2601_v13 = vsel %vm2456_vm8, %v469_v6, %v473_v59  ;;  %v1868_v38 = vpack.c.bf16 %v356_v29, %v356_v29  ;;  %v483_v41 = vrot.slane %v482_v21, 4 }
  0x33   : > { %1368 = vmatmul.mubr.bf16.gmra.mrb[4].mxu1 %v2580_v1  ;;  %v303_v63 = vadd.f32 %v2391_v45, %v276_v9  ;;  %v2610_v26 = vcombine.low %v2530_v18, %v2601_v13  ;;  %v485_v54 = vshll.u32 %v1867_v36, 16 }
  0x34   : > { %v357_v32 = vsel %vm341_vm1, %v322_v20, 0.0  ;;  %v490_v55 = vshrl.u32 %v1868_v38, 16  ;;  %v493_v56 = vshll.u32 %v1868_v38, 16  ;;  %v1749_v0 = vrot.slane %v1868_v38, 9  ;;  %v2192_v20 = vld [vmem:[%s2877_s1 + $0x1f0] sm:$0xff]  }
  0x35   : > { %1998 = vmatpush3.bf16.msra.mxu0 %v2177_v40  ;;  %2040 = vmatpush3.bf16.msra.mxu1 %v2182_v62  ;;  %v1869_v40 = vpack.c.bf16 %v357_v32, %v357_v32  ;;  %v2632_v46 = vmax.f32 %v303_v63, 0.0  ;;  %v552_v62 = vrot.slane %v1867_v36, 5  ;;  %v487_v4 = vrot.slane %v485_v54, 5  ;;  %v2193_v36 = vld [vmem:[%s2877_s1 + $0x130] sm:$0xff]   ;;  %v2195_v54 = vld [vmem:[%s2877_s1 + $0x178] sm:$0xff]  }
  0x36   : > { %1999 = vmatprep.subr.bf16.mxu0 %v2179_v61  ;;  %2041 = vmatprep.subr.bf16.mxu1 %v2184_v10  ;;  %v492_v6 = vrot.slane %v490_v55, 4  ;;  %v495_v7 = vrot.slane %v493_v56, 5  ;;  %v304_v32 = vadd.f32 %v2391_v45, %v277_v16 }
  0x37   : > { %1302 = vmatprep.mubr.bf16.mxu0 %v2610_v26  ;;  %v499_v57 = vshll.u32 %v1869_v40, 16  ;;  %v358_v59 = vsel %vm334_vm0, %v2632_v46, 0.0  ;;  %v1899_v61 = vpack.c.bf16 %v2632_v46, %v2597_v19  ;;  %v2657_v10 = vsel %vm2441_vm7, %v1748_v5, %v552_v62  ;;  %v2191_v5 = vld [vmem:[%s2877_s1 + $0x170] sm:$0xff]  }
  0x38   : > { %1885 = vmatmul.mubr.msk.bf16.gmra.mrb[4].mxu0 %vm2432_vm6, %v2591_v11  ;;  %v2651_v9 = vpack.c.bf16 %v358_v59, %v358_v59  ;;  %v2665_v21 = vsel %vm2456_vm8, %v483_v41, %v487_v4  ;;  %v496_v63 = vor.u32 %v495_v7, %v492_v6  ;;  %v2725_v4 = vld [vmem:[%s2877_s1 + $0x200] sm:$0xff]   ;;  %v2197_v7 = vld [vmem:[%s2877_s1 + $0x138] sm:$0xff]  }
  0x39   : > { %2000 = vmatpush3.bf16.msra.mxu0 %v2181_v12  ;;  %2042 = vmatpush3.bf16.msra.mxu1 %v2186_v35  ;;  %v501_v8 = vrot.slane %v499_v57, 5  ;;  %v556_v12 = vrot.slane %v1869_v40, 5 }
  0x3a   : > { %2001 = vmatprep.subr.bf16.mxu0 %v2183_v22  ;;  %2043 = vmatprep.subr.bf16.mxu1 %v2188_v43  ;;  %v278_v22 = vmul.f32 %v2386_v44, %v251_v3  ;;  %v507_v35 = vshll.u32 %v2651_v9, 16  ;;  %v2194_v44 = vld [vmem:[%s2877_s1 + $0x1b0] sm:$0xff]   ;;  %v497_v38 = vrot.slane %v496_v63, 4  ;;  %v2196_v43 = vld [vmem:[%s2877_s1 + $0x1f8] sm:$0xff]   ;;  %v1750_v62 = vrot.slane %v2651_v9, 9 }
  0x3b   : > { %1900 = vmatprep.mubr.msk.bf16.mxu1 %vm2432_vm6, %v1899_v61  ;;  %v2674_v29 = vsel %vm2441_vm7, %v1749_v0, %v556_v12  ;;  %v2198_v3 = vld [vmem:[%s2877_s1 + $0x1b8] sm:$0xff]  }
  0x3c   : > { %v2687_v40 = vcombine.low %v2657_v10, %v2674_v29  ;;  %v305_v41 = vadd.f32 %v2391_v45, %v278_v22  ;;  %v509_v52 = vrot.slane %v507_v35, 5  ;;  %v2699_v55 = vsel %vm2456_vm8, %v497_v38, %v501_v8 }
  0x3d   : > { %2002 = vmatpush3.bf16.msra.mxu0 %v2185_v34  ;;  %2044 = vmatpush3.bf16.msra.mxu1 %v2190_v47  ;;  %v504_v34 = vshrl.u32 %v2651_v9, 16  ;;  %v324_v47 = vmax.f32 %v304_v32, 0.0  ;;  %v2708_v59 = vcombine.low %v2665_v21, %v2699_v55  ;;  %v1874_v8 = vpack.c.bf16 %v2526_v17, %v2526_v17 }
  0x3e   : > { %2003 = vmatprep.subr.bf16.mxu0 %v2187_v42  ;;  %v306_v42 = vadd.f32 %v2391_v45, %v279_v28  ;;  %2045 = vmatprep.subr.bf16.mxu1 %v2192_v20  ;;  %v2703_v45 = vpack.c.bf16 %v2597_v19, %v2519_v15  ;;  %v325_v56 = vmax.f32 %v305_v41, 0.0  ;;  %v1875_v20 = vpack.c.bf16 %v2731_v30, %v2731_v30 }
  0x3f   : > { %v506_v51 = vrot.slane %v504_v34, 4  ;;  %1376 = vmatmul.mubr.bf16.gmra.mrb[8].mxu1 %v2687_v40  ;;  %v359_v61 = vsel %vm341_vm1, %v324_v47, 0.0  ;;  %1310 = vmatprep.mubr.bf16.mxu0 %v2708_v59  ;;  %v1754_v28 = vrot.slane %v1874_v8, 9 }
  0x40   : > { %v326_v57 = vmax.f32 %v306_v42, 0.0  ;;  %v360_v0 = vsel %vm334_vm0, %v325_v56, 0.0  ;;  %v1871_v19 = vpack.c.bf16 %v359_v61, %v359_v61  ;;  %1888 = vmatmul.mubr.msk.bf16.gmra.mrb[8].mxu0 %vm2432_vm6, %v2703_v45  ;;  %v587_v42 = vrot.slane %v1875_v20, 5 }
  0x41   : > { %2004 = vmatpush3.bf16.msra.mxu0 %v2189_v2  ;;  %2046 = vmatpush3.bf16.msra.mxu1 %v2194_v44  ;;  %v1902_v2 = vpack.c.bf16 %v327_v48, %v325_v56  ;;  %v1872_v24 = vpack.c.bf16 %v360_v0, %v360_v0  ;;  %v510_v6 = vor.u32 %v509_v52, %v506_v51  ;;  %v581_v37 = vshll.u32 %v1875_v20, 16 }
  0x42   : > { %2005 = vmatprep.subr.bf16.mxu0 %v2191_v5  ;;  %v361_v15 = vsel %vm341_vm1, %v326_v57, 0.0  ;;  %2047 = vmatprep.subr.bf16.mxu1 %v2196_v43  ;;  %v513_v33 = vshll.u32 %v1871_v19, 16  ;;  %v560_v25 = vrot.slane %v1871_v19, 5  ;;  %v2767_v51 = vsel %vm2441_vm7, %v1754_v28, %v587_v42  ;;  %v2200_v19 = vld [vmem:[%s2877_s1 + $0x208] sm:$0xff]  }
  0x43   : > { %v1873_v48 = vpack.c.bf16 %v361_v15, %v361_v15  ;;  %1903 = vmatprep.mubr.msk.bf16.mxu1 %vm2432_vm6, %v1902_v2  ;;  %v518_v49 = vshrl.u32 %v1872_v24, 16  ;;  %v521_v9 = vshll.u32 %v1872_v24, 16  ;;  %v1751_v16 = vrot.slane %v1872_v24, 9 }
  0x44   : > { %v2748_v63 = vsel %vm2441_vm7, %v1750_v62, %v560_v25  ;;  %v511_v5 = vrot.slane %v510_v6, 4  ;;  %v515_v32 = vrot.slane %v513_v33, 5  ;;  %v1784_v52 = vcombine.low %v2767_v51, %v2463_v39 }
  0x45   : > { %2006 = vmatpush3.bf16.msra.mxu0 %v2193_v36  ;;  %v527_v12 = vshll.u32 %v1873_v48, 16  ;;  %2048 = vmatpush3.bf16.msra.mxu1 %v2198_v3  ;;  %v564_v22 = vrot.slane %v1873_v48, 5  ;;  %v520_v34 = vrot.slane %v518_v49, 4  ;;  %v523_v35 = vrot.slane %v521_v9, 5 }
  0x46   : > { %2007 = vmatprep.subr.bf16.mxu0 %v2195_v54  ;;  %2109 = vmatprep.subr.bf16.mxu1 %v2725_v4  ;;  %v2762_v43 = vsel %vm2456_vm8, %v511_v5, %v515_v32  ;;  %v572_v54 = vshrl.u32 %v1874_v8, 16  ;;  %v575_v57 = vshll.u32 %v1874_v8, 16  ;;  %v1890_v62 = vpack.c.bf16 %v325_v56, %v2632_v46  ;;  %v2201_v56 = vld [vmem:[%s2877_s1 + $0x210] sm:$0xff]  }
  0x47   : > { %v2753_v36 = vsel %vm2441_vm7, %v1751_v16, %v564_v22  ;;  %v524_v44 = vor.u32 %v523_v35, %v520_v34  ;;  %v529_v38 = vrot.slane %v527_v12, 5  ;;  %v1774_v46 = vcombine.low %v2488_v58, %v2530_v18 }
  0x48   : > { %v2758_v41 = vcombine.low %v2748_v63, %v2753_v36  ;;  %v574_v15 = vrot.slane %v572_v54, 4  ;;  %v1779_v2 = vcombine.low %v2569_v60, %v2657_v10  ;;  %v1775_v18 = vcombine.low %v2601_v13, %v2665_v21  ;;  %v2203_v60 = vld [vmem:[%s2877_s1 + $0x220] sm:$0xff]   ;;  %v2205_v21 = vld [vmem:[%s2877_s1 + $0x230] sm:$0xff]  }
  0x49   : > { %2008 = vmatpush3.bf16.msra.mxu0 %v2197_v7  ;;  %v525_v47 = vrot.slane %v524_v44, 4  ;;  %v1780_v10 = vcombine.low %v2674_v29, %v2748_v63  ;;  %v374_v13 = vpack.c.bf16 %v2731_v30, %v2526_v17  ;;  %v1781_v29 = vcombine.low %v2753_v36, %v2767_v51  ;;  %v2206_v17 = vld [vmem:[%s2877_s1 + $0x238] sm:$0xff]  }
  0x4a   : > { %2085 = vmatprep.subr.bf16.mxu0 %v2725_v4  ;;  %1384 = vmatmul.mubr.bf16.gmra.mrb[12].mxu1 %v2758_v41 }
  0x4b   : > { %1489 = vmatprep.mubr.bf16.mxu1 %v2610_v26  ;;  %v2774_v61 = vsel %vm2456_vm8, %v525_v47, %v529_v38  ;;  %v577_v26 = vrot.slane %v575_v57, 5  ;;  %v1782_v14 = vcombine.low %v374_v13, %v2215_v27 }
  0x4c   : > { %v1765_v0 = vcombine.low %v2762_v43, %v2774_v61 }
  0x4d   : > { %v578_v53 = vor.u32 %v577_v26, %v574_v15 }
  0x4e   : > { %1318 = vmatprep.mubr.bf16.mxu0 %v1765_v0 }
  0x4f   : > { %1891 = vmatmul.mubr.msk.bf16.gmra.mrb[12].mxu0 %vm2432_vm6, %v1890_v62  ;;  %v579_v3 = vrot.slane %v578_v53, 4 }
  0x50   : > { %1424 = vmatprep.mubr.bf16.mxu0 %v1778_v23 }
  0x52   : > { %1906 = vmatmul.mubr.msk.bf16.vlgmr.msra.gmra.mrb[16].mxu1 %vm2432_vm6, %v2591_v11  ;;  %v583_v11 = vrot.slane %v581_v37, 5 }
  0x53   : > { %2117 = vmatpush3.bf16.msra.mxu1 %v2725_v4  ;;  %1497 = vmatprep.mubr.bf16.mxu1 %v2708_v59  ;;  %v2202_v59 = vld [vmem:[%s2877_s1 + $0x218] sm:$0xff]  }
  0x54   : > { %2110 = vmatprep.subr.bf16.mxu1 %v2200_v19  ;;  %v584_v58 = vsel %vm2456_vm8, %v579_v3, %v583_v11 }
  0x57   : > { %2118 = vmatpush3.bf16.msra.mxu1 %v2200_v19  ;;  %1425 = vmatmul.mubr.bf16.vlgmr.msra.gmra.mrb[16].mxu0 %v1774_v46 }
  0x58   : > { %2111 = vmatprep.subr.bf16.mxu1 %v2201_v56  ;;  %2086 = vmatpush3.bf16.msra.mxu0 %v2725_v4 }
  0x59   : > { %1432 = vmatprep.mubr.bf16.mxu0 %v1779_v2  ;;  %2087 = vmatprep.subr.bf16.mxu0 %v2200_v19 }
  0x5a   : > { %1909 = vmatmul.mubr.msk.bf16.gmra.mrb[20].mxu1 %vm2432_vm6, %v2703_v45  ;;  %v1783_v45 = vcombine.low %v584_v58, %v2472_v50  ;;  %v1776_v50 = vcombine.low %v2699_v55, %v2762_v43  ;;  %v1777_v55 = vcombine.low %v2774_v61, %v584_v58 }
  0x5b   : > { %2119 = vmatpush3.bf16.msra.mxu1 %v2201_v56  ;;  %1505 = vmatprep.mubr.bf16.mxu1 %v1765_v0 }
  0x5c   : > { %2112 = vmatprep.subr.bf16.mxu1 %v2202_v59  ;;  %2088 = vmatpush3.bf16.msra.mxu0 %v2200_v19 }
  0x5d   : > { %2089 = vmatprep.subr.bf16.mxu0 %v2201_v56 }
  0x5f   : > { %2120 = vmatpush3.bf16.msra.mxu1 %v2202_v59  ;;  %1433 = vmatmul.mubr.bf16.gmra.mrb[20].mxu0 %v1775_v18 }
  0x60   : > { %2113 = vmatprep.subr.bf16.mxu1 %v2203_v60  ;;  %2090 = vmatpush3.bf16.msra.mxu0 %v2201_v56 }
  0x61   : > { %1440 = vmatprep.mubr.bf16.mxu0 %v1780_v10  ;;  %2091 = vmatprep.subr.bf16.mxu0 %v2202_v59 }
  0x62   : > { %1912 = vmatmul.mubr.msk.bf16.gmra.mrb[24].mxu1 %vm2432_vm6, %v1890_v62 }
  0x63   : > { %2121 = vmatpush3.bf16.msra.mxu1 %v2203_v60  ;;  %1513 = vmatprep.mubr.bf16.mxu1 %v1783_v45 }
  0x64   : > { %2114 = vmatprep.subr.bf16.mxu1 %v2204_v31  ;;  %2092 = vmatpush3.bf16.msra.mxu0 %v2202_v59 }
  0x65   : > { %2093 = vmatprep.subr.bf16.mxu0 %v2203_v60 }
  0x67   : > { %2122 = vmatpush3.bf16.msra.mxu1 %v2204_v31  ;;  %1441 = vmatmul.mubr.bf16.gmra.mrb[24].mxu0 %v1776_v50 }
  0x68   : > { %2115 = vmatprep.subr.bf16.mxu1 %v2205_v21  ;;  %2094 = vmatpush3.bf16.msra.mxu0 %v2203_v60 }
  0x69   : > { %1448 = vmatprep.mubr.bf16.mxu0 %v1781_v29  ;;  %2095 = vmatprep.subr.bf16.mxu0 %v2204_v31 }
  0x6a   : > { %1514 = vmatmul.mubr.bf16.gmra.mrb[28].mxu1 %v1782_v14 }
  0x6b   : > { %2123 = vmatpush3.bf16.msra.mxu1 %v2205_v21  ;;  %2105 = vmatprep.mubr.bf16.mxu1 %v2758_v41 }
  0x6c   : > { %2116 = vmatprep.subr.bf16.mxu1 %v2206_v17  ;;  %2096 = vmatpush3.bf16.msra.mxu0 %v2204_v31 }
  0x6d   : > { %2097 = vmatprep.subr.bf16.mxu0 %v2205_v21 }
  0x6f   : > { %2124 = vmatpush3.bf16.msra.mxu1 %v2206_v17  ;;  %1449 = vmatmul.mubr.bf16.gmra.mrb[28].mxu0 %v1777_v55 }
  0x70   : > { %2098 = vmatpush3.bf16.msra.mxu0 %v2205_v21  ;;  %2101 = vmatprep.mubr.bf16.mxu0 %v2580_v1 }
  0x71   : > { %2099 = vmatprep.subr.bf16.mxu0 %v2206_v17 }
  0x72   : > { %2106 = vmatmul.mubr.bf16.vlgmr.msra.gmra.mrb[32].mxu1 %v1784_v52 }
  0x74   : > { %2100 = vmatpush3.bf16.msra.mxu0 %v2206_v17 }
  0x77   : > { %2102 = vmatmul.mubr.bf16.vlgmr.msra.gmra.mrb[32].mxu0 %v2687_v40 }
  0xfb   : > { %v1969_v27 = vpop.f32.mrb[0].mxu1 }
  0xfc   : > { %v1970_v4 = vpop.f32.mrb[1].mxu1 }
  0xfd   : > { %v1971_v24 = vadd.f32 %v1970_v4, %v1969_v27  ;;  %v1972_v48 = vpop.f32.mrb[2].mxu1 }
  0xfe   : > { %v1973_v7 = vpop.f32.mrb[3].mxu1 }
  0xff   : > { %v1929_v30 = vpop.f32.mrb[0].mxu0  ;;  %v1974_v25 = vadd.f32 %v1973_v7, %v1972_v48 }
 0x100   : > { %v1930_v6 = vpop.f32.mrb[1].mxu0 }
 0x101   : > { %v1931_v8 = vadd.f32 %v1930_v6, %v1929_v30  ;;  %v1932_v33 = vpop.f32.mrb[2].mxu0 }
 0x102   : > { %v1933_v49 = vpop.f32.mrb[3].mxu0 }
 0x103   : > { %v1362_v1 = vadd.f32 %v1971_v24, %v1931_v8  ;;  %v1934_v9 = vadd.f32 %v1933_v49, %v1932_v33 }
 0x105   : > { %v1365_v12 = vadd.f32 %v1974_v25, %v1934_v9 }
 0x106   : > { %v1975_v16 = vpop.f32.mrb[4].mxu1 }
 0x107   : > { %v1976_v39 = vpop.f32.mrb[5].mxu1 }
 0x108   : > { %v1977_v20 = vadd.f32 %v1976_v39, %v1975_v16  ;;  %v1978_v63 = vpop.f32.mrb[6].mxu1 }
 0x109   : > { %v1979_v22 = vpop.f32.mrb[7].mxu1 }
 0x10a   : > { %v1980_v40 = vadd.f32 %v1979_v22, %v1978_v63 }
 0x10b   : > { %v1935_v28 = vpop.f32.mrb[4].mxu0 }
 0x10c   : > { %v1936_v5 = vpop.f32.mrb[5].mxu0 }
 0x10d   : > { %v1937_v32 = vadd.f32 %v1936_v5, %v1935_v28  ;;  %v1938_v34 = vpop.f32.mrb[6].mxu0 }
 0x10e   : > { %v1939_v35 = vpop.f32.mrb[7].mxu0 }
 0x10f   : > { %v1370_v36 = vadd.f32 %v1977_v20, %v1937_v32  ;;  %v1940_v44 = vadd.f32 %v1939_v35, %v1938_v34 }
 0x111   : > { %v2840_v38 = vadd.f32 %v1980_v40, %v1940_v44 }
 0x112   : > { %v1981_v41 = vpop.f32.mrb[8].mxu1 }
 0x113   : > { %v1982_v42 = vpop.f32.mrb[9].mxu1  ;;  %v1941_v52 = vpop.f32.mrb[8].mxu0 }
 0x114   : > { %v1983_v43 = vadd.f32 %v1982_v42, %v1981_v41  ;;  %v1984_v47 = vpop.f32.mrb[10].mxu1  ;;  %v1942_v57 = vpop.f32.mrb[9].mxu0 }
 0x115   : > { %v1985_v51 = vpop.f32.mrb[11].mxu1  ;;  %v1943_v61 = vadd.f32 %v1942_v57, %v1941_v52  ;;  %v1944_v62 = vpop.f32.mrb[10].mxu0 }
 0x116   : > { %v1986_v54 = vadd.f32 %v1985_v51, %v1984_v47  ;;  %v1945_v0 = vpop.f32.mrb[11].mxu0 }
 0x117   : > { %v1378_v23 = vadd.f32 %v1983_v43, %v1943_v61  ;;  %v1946_v15 = vadd.f32 %v1945_v0, %v1944_v62 }
 0x119   : > { %v2842_v26 = vadd.f32 %v1986_v54, %v1946_v15 }
 0x11d   : > { %v1987_v19 = vpop.f32.mrb[12].mxu1 }
 0x11e   : > { %v1988_v53 = vpop.f32.mrb[13].mxu1 }
 0x11f   : > { %v1989_v37 = vadd.f32 %v1988_v53, %v1987_v19  ;;  %v1990_v46 = vpop.f32.mrb[14].mxu1 }
 0x120   : > { %v1991_v56 = vpop.f32.mrb[15].mxu1 }
 0x121   : > { %v1992_v2 = vadd.f32 %v1991_v56, %v1990_v46 }
 0x122   : > { %v1947_v3 = vpop.f32.mrb[12].mxu0 }
 0x123   : > { %v1948_v11 = vpop.f32.mrb[13].mxu0 }
 0x124   : > { %v1949_v59 = vadd.f32 %v1948_v11, %v1947_v3  ;;  %v1950_v58 = vpop.f32.mrb[14].mxu0 }
 0x125   : > { %v2049_v18 = vpop.f32.mrb[16].mxu1  ;;  %v1951_v60 = vpop.f32.mrb[15].mxu0 }
 0x126   : > { %v2050_v10 = vpop.f32.mrb[17].mxu1  ;;  %v2844_v45 = vadd.f32 %v1989_v37, %v1949_v59  ;;  %v1952_v31 = vadd.f32 %v1951_v60, %v1950_v58 }
 0x127   : > { %v2051_v13 = vadd.f32 %v2050_v10, %v2049_v18  ;;  %v2052_v50 = vpop.f32.mrb[18].mxu1 }
 0x128   : > { %v2053_v21 = vpop.f32.mrb[19].mxu1  ;;  %v2846_v29 = vadd.f32 %v1992_v2, %v1952_v31 }
 0x129   : > { %v2054_v14 = vadd.f32 %v2053_v21, %v2052_v50 }
 0x12a   : > { %v2009_v17 = vpop.f32.mrb[16].mxu0 }
 0x12b   : > { %v2010_v55 = vpop.f32.mrb[17].mxu0 }
 0x12c   : > { %v2011_v27 = vadd.f32 %v2010_v55, %v2009_v17  ;;  %v2012_v4 = vpop.f32.mrb[18].mxu0 }
 0x12d   : > { %v2055_v30 = vpop.f32.mrb[20].mxu1  ;;  %v2013_v24 = vpop.f32.mrb[19].mxu0 }
 0x12e   : > { %v2056_v48 = vpop.f32.mrb[21].mxu1  ;;  %v1427_v6 = vadd.f32 %v2011_v27, %v1362_v1  ;;  %v2014_v7 = vadd.f32 %v2013_v24, %v2012_v4 }
 0x12f   : > { %v2057_v8 = vadd.f32 %v2056_v48, %v2055_v30  ;;  %v2058_v33 = vpop.f32.mrb[22].mxu1 }
 0x130   : > { %v2059_v25 = vpop.f32.mrb[23].mxu1  ;;  %v1430_v49 = vadd.f32 %v2014_v7, %v1365_v12  ;;  %v1492_v16 = vadd.f32 %v2051_v13, %v1427_v6 }
 0x131   : > { %v2060_v9 = vadd.f32 %v2059_v25, %v2058_v33 }
 0x132   : > { %v2015_v39 = vpop.f32.mrb[20].mxu0  ;;  %v2848_v20 = vadd.f32 %v2054_v14, %v1430_v49 }
 0x133   : > { %v2016_v63 = vpop.f32.mrb[21].mxu0 }
 0x134   : > { %v2017_v22 = vadd.f32 %v2016_v63, %v2015_v39  ;;  %v2018_v40 = vpop.f32.mrb[22].mxu0 }
 0x135   : > { %v2061_v28 = vpop.f32.mrb[24].mxu1  ;;  %v2019_v5 = vpop.f32.mrb[23].mxu0 }
 0x136   : > { %v2062_v32 = vpop.f32.mrb[25].mxu1  ;;  %v1435_v34 = vadd.f32 %v2017_v22, %v1370_v36  ;;  %v2020_v35 = vadd.f32 %v2019_v5, %v2018_v40 }
 0x137   : > { %v2063_v44 = vadd.f32 %v2062_v32, %v2061_v28  ;;  %v2064_v1 = vpop.f32.mrb[26].mxu1 }
 0x138   : > { %v2065_v41 = vpop.f32.mrb[27].mxu1  ;;  %v1438_v42 = vadd.f32 %v2020_v35, %v2840_v38  ;;  %v1500_v12 = vadd.f32 %v2057_v8, %v1435_v34 }
 0x139   : > { %v2066_v43 = vadd.f32 %v2065_v41, %v2064_v1 }
 0x13a   : > { %v2021_v47 = vpop.f32.mrb[24].mxu0  ;;  %v1503_v51 = vadd.f32 %v2060_v9, %v1438_v42 }
 0x13b   : > { %v2022_v52 = vpop.f32.mrb[25].mxu0 }
 0x13c   : > { %v2023_v54 = vadd.f32 %v2022_v52, %v2021_v47  ;;  %v2024_v57 = vpop.f32.mrb[26].mxu0 }
 0x13d   : > { %v2067_v61 = vpop.f32.mrb[28].mxu1  ;;  %v2025_v62 = vpop.f32.mrb[27].mxu0 }
 0x13e   : > { %v2068_v0 = vpop.f32.mrb[29].mxu1  ;;  %v1443_v15 = vadd.f32 %v2023_v54, %v1378_v23  ;;  %v2026_v19 = vadd.f32 %v2025_v62, %v2024_v57 }
 0x13f   : > { %v2069_v36 = vadd.f32 %v2068_v0, %v2067_v61  ;;  %v2070_v53 = vpop.f32.mrb[30].mxu1 }
 0x140   : > { %v2071_v37 = vpop.f32.mrb[31].mxu1  ;;  %v1446_v46 = vadd.f32 %v2026_v19, %v2842_v26  ;;  %v1508_v38 = vadd.f32 %v2063_v44, %v1443_v15 }
 0x141   : > { %v2072_v56 = vadd.f32 %v2071_v37, %v2070_v53 }
 0x142   : > { %v2027_v2 = vpop.f32.mrb[28].mxu0  ;;  %v1511_v3 = vadd.f32 %v2066_v43, %v1446_v46 }
 0x143   : > { %v2028_v11 = vpop.f32.mrb[29].mxu0 }
 0x144   : > { %v2029_v59 = vadd.f32 %v2028_v11, %v2027_v2  ;;  %v2030_v58 = vpop.f32.mrb[30].mxu0 }
 0x145   : > { %v2107_v18 = vpop.f32.mrb[32].mxu1  ;;  %v2031_v60 = vpop.f32.mrb[31].mxu0 }
 0x146   : > { %v1572_v23 = vpop.f32.mrb[33].mxu1  ;;  %v1451_v26 = vadd.f32 %v2029_v59, %v2844_v45  ;;  %v2032_v10 = vadd.f32 %v2031_v60, %v2030_v58 }
 0x147   : > { %v1573_v31 = vadd.f32 %v1572_v23, %v1508_v38  ;;  %v2108_v13 = vpop.f32.mrb[34].mxu1 }
 0x148   : > { %v1575_v50 = vpop.f32.mrb[35].mxu1  ;;  %v1454_v21 = vadd.f32 %v2032_v10, %v2846_v29  ;;  %v1516_v14 = vadd.f32 %v2069_v36, %v1451_v26 }
 0x149   : > { %1627 = vst [vmem:[%s2856_s14 + $0x20] sm:$0xff] %v1573_v31  ;;  %v1576_v17 = vadd.f32 %v1575_v50, %v1511_v3  ;;  %v1605_v28 = vmul.f32 %v1573_v31, %v1573_v31 }
 0x14a   : > { %v2103_v55 = vpop.f32.mrb[32].mxu0  ;;  %v1581_v27 = vadd.f32 %v2107_v18, %v1516_v14  ;;  %v1519_v4 = vadd.f32 %v2072_v56, %v1454_v21 }
 0x14b   : > { %1628 = vst [vmem:[%s2856_s14 + $0x28] sm:$0xff] %v1576_v17  ;;  %v1565_v30 = vadd.f32 %v2103_v55, %v1500_v12  ;;  %v1556_v45 = vpop.f32.mrb[33].mxu0  ;;  %v1606_v35 = vmul.f32 %v1576_v17, %v1576_v17 }
 0x14c   : > { %1629 = vst [vmem:[%s2856_s14 + $0x30] sm:$0xff] %v1581_v27  ;;  %v1557_v24 = vadd.f32 %v1556_v45, %v1492_v16  ;;  %v2104_v48 = vpop.f32.mrb[34].mxu0  ;;  %v1584_v6 = vadd.f32 %v2108_v13, %v1519_v4  ;;  %v1607_v1 = vmul.f32 %v1581_v27, %v1581_v27 }
 0x14d   : > { %1625 = vst [vmem:[%s2856_s14 + $0x10] sm:$0xff] %v1565_v30  ;;  %v1568_v7 = vadd.f32 %v2104_v48, %v1503_v51  ;;  %v1559_v29 = vpop.f32.mrb[35].mxu0  ;;  %v1603_v9 = vmul.f32 %v1565_v30, %v1565_v30 }
 0x14e   : > { %1623 = vst [vmem:[%s2856_s14] sm:$0xff] %v1557_v24  ;;  %1630 = vst [vmem:[%s2856_s14 + $0x38] sm:$0xff] %v1584_v6  ;;  %v1560_v8 = vadd.f32 %v1559_v29, %v2848_v20  ;;  %v1601_v33 = vmul.f32 %v1557_v24, %v1557_v24  ;;  %v1608_v42 = vmul.f32 %v1584_v6, %v1584_v6 }
 0x14f   : > { %1626 = vst [vmem:[%s2856_s14 + $0x18] sm:$0xff] %v1568_v7  ;;  %v1604_v22 = vmul.f32 %v1568_v7, %v1568_v7 }
 0x150   : > { %v1587_v25 = vadd.f32 %v1560_v8, %v1557_v24  ;;  %v1602_v49 = vmul.f32 %v1560_v8, %v1560_v8  ;;  %1624 = vst [vmem:[%s2856_s14 + $0x8] sm:$0xff] %v1560_v8 }
 0x152   : > { %v1588_v39 = vadd.f32 %v1587_v25, %v1565_v30  ;;  %v1609_v63 = vadd.f32 %v1602_v49, %v1601_v33 }
 0x154   : > { %v1610_v40 = vadd.f32 %v1609_v63, %v1603_v9  ;;  %v1589_v16 = vadd.f32 %v1588_v39, %v1568_v7 }
 0x156   : > { %v1590_v5 = vadd.f32 %v1589_v16, %v1573_v31  ;;  %v1611_v32 = vadd.f32 %v1610_v40, %v1604_v22 }
 0x158   : > { %v1591_v34 = vadd.f32 %v1590_v5, %v1576_v17  ;;  %v1612_v44 = vadd.f32 %v1611_v32, %v1605_v28 }
 0x15a   : > { %v1592_v20 = vadd.f32 %v1591_v34, %v1581_v27  ;;  %v1613_v41 = vadd.f32 %v1612_v44, %v1606_v35 }
 0x15c   : > { %v1593_v43 = vadd.f32 %v1592_v20, %v1584_v6  ;;  %v1614_v12 = vadd.f32 %v1613_v41, %v1607_v1 }
 0x15e   : > { %v1594_v47 = vrot.slane %v1593_v43, 4  ;;  %v1615_v51 = vadd.f32 %v1614_v12, %v1608_v42 }
 0x160   : > { %v1595_v52 = vadd.f32 %v1594_v47, %v1593_v43  ;;  %v1616_v54 = vrot.slane %v1615_v51, 4 }
 0x162   : > { %v1596_v57 = vrot.slane %v1595_v52, 2  ;;  %v1617_v61 = vadd.f32 %v1616_v54, %v1615_v51 }
 0x164   : > { %v1597_v62 = vadd.f32 %v1596_v57, %v1595_v52  ;;  %v1618_v0 = vrot.slane %v1617_v61, 2 }
 0x166   : > { %v1598_v15 = vrot.slane %v1597_v62, 1  ;;  %v1619_v19 = vadd.f32 %v1618_v0, %v1617_v61 }
 0x168   : > { %v1599_v36 = vadd.f32 %v1598_v15, %v1597_v62  ;;  %v1620_v53 = vrot.slane %v1619_v19, 1 }
 0x16a   : > { %1600 = vst [vmem:[%s235_s20] sm:$0x1] %v1599_v36  ;;  %v1621_v37 = vadd.f32 %v1620_v53, %v1619_v19 }
 0x16c   : > { %1622 = vst [vmem:[%s235_s20 + $0x1] sm:$0x1] %v1621_v37 }
 0x16d PF: > { %s16_s18 = sadd.s32 1, %s2213_s18  }
 0x16e   : > { %p13_p4 = scmp.ge.s32.totalorder %s16_s18, 4  }
 0x170   :  { %15 = sbr.rel (!%p13_p4) target bundleno = 1 (0x1), region = 78 }

// kernel: basic_block.3
= control target key start
LH: loop header
LB: loop body
LE: loop exit
PB: predicated region body
PF: predicated region fallthrough
CT: control target
= control target key end

     0   :  { %s2024_s12 = smov 0   ;;  %s2515_s0 = inlined_call_operand.vmem [shape: bf16[2,10,10,128], index: 0, kind: input, shape index: {}]   ;;  %s2516_s1 = inlined_call_operand.vmem [shape: bf16[1152,128], index: 1, kind: input, shape index: {}]   ;;  %s2517_s2 = inlined_call_operand.vmem [shape: f32[2,10,10,128], index: 2, kind: output, shape index: {0}]   ;;  %s2518_s3 = inlined_call_operand.vmem [shape: f32[2,2,128], index: 3, kind: output, shape index: {1}]  }
   0x1 LB: > { %s1546_s13 = sadd.s32 4294967295, %s2001_s12   ;;  %p1550_p0 = scmp.ge.s32.totalorder %s2001_s12, 1  ;;  %s2001_s12 = sphi %s2024_s12, %s14_s12  }
   0x2   : > { %p140_p1 = scmp.lt.s32.totalorder %s2001_s12, 3 }
   0x4   : > { %p141_p2 = pnand %p1550_p0, %p140_p1 }
   0x5   : > { %v1914_v0 = vld [vmem:[%s2516_s1 + $0x40] sm:$0xff] (!%p141_p2)   ;;  %p168_p3 = scmp.lt.s32.totalorder (!%p141_p2), %s1546_s13, 1  ;;  %v1918_v4 = vld [vmem:[%s2516_s1 + $0x48] sm:$0xff] (!%p141_p2)   ;;  %v1922_v8 = vld [vmem:[%s2516_s1 + $0x50] sm:$0xff] (!%p141_p2)   ;;  %v2003_v9 = vmov (!%p141_p2), 0.0   ;;  %vm334_vm0 = vcmask (!%p141_p2), 1042432  }
   0x6   : > { %144 = sbr.rel (%p141_p2) target bundleno = 349 (0x15d), region = 28  ;;  %v1915_v1 = vld [vmem:[%s2516_s1 + $0xc0] sm:$0xff] (!%p141_p2)   ;;  %1691 = vmatprep.subr.bf16.mxu0 (!%p141_p2), %v1914_v0  ;;  %v1919_v5 = vld [vmem:[%s2516_s1 + $0xc8] sm:$0xff] (!%p141_p2)   ;;  %v1923_v10 = vld [vmem:[%s2516_s1 + $0xd0] sm:$0xff] (!%p141_p2)   ;;  %vm335_vm1 = vcmask (!%p141_p2), 1046532  }
   0x7   : > { %v1916_v2 = vld [vmem:[%s2516_s1] sm:$0xff] (!%p141_p2)   ;;  %1731 = vmatprep.subr.bf16.mxu1 (!%p141_p2), %v1915_v1  ;;  %v1920_v6 = vld [vmem:[%s2516_s1 + $0x8] sm:$0xff] (!%p141_p2)   ;;  %v1924_v11 = vld [vmem:[%s2516_s1 + $0x10] sm:$0xff] (!%p141_p2)   ;;  %vm203_vm2 = vsmask.f32 (!%p141_p2), 3328 }
   0x8   : > { %v1917_v3 = vld [vmem:[%s2516_s1 + $0x80] sm:$0xff] (!%p141_p2)   ;;  %1692 = vmatpush3.bf16.msra.mxu0 (!%p141_p2), %v1916_v2  ;;  %v1921_v7 = vld [vmem:[%s2516_s1 + $0x88] sm:$0xff] (!%p141_p2)   ;;  %v1925_v12 = vld [vmem:[%s2516_s1 + $0x90] sm:$0xff] (!%p141_p2)   ;;  %vm204_vm3 = vsmask.f32 (!%p141_p2), 7440 }
   0x9   : > { %1732 = vmatpush3.bf16.msra.mxu1 (!%p141_p2), %v1917_v3  ;;  %1693 = vmatprep.subr.bf16.mxu0 (!%p141_p2), %v1918_v4  ;;  %v1926_v13 = vld [vmem:[%s2516_s1 + $0x58] sm:$0xff] (!%p141_p2)   ;;  %v1930_v17 = vld [vmem:[%s2516_s1 + $0x60] sm:$0xff] (!%p141_p2)   ;;  %v1934_v21 = vld [vmem:[%s2516_s1 + $0x68] sm:$0xff] (!%p141_p2)  }
   0xa   : > { %1733 = vmatprep.subr.bf16.mxu1 (!%p141_p2), %v1919_v5  ;;  %v1927_v14 = vld [vmem:[%s2516_s1 + $0xd8] sm:$0xff] (!%p141_p2)   ;;  %v1931_v18 = vld [vmem:[%s2516_s1 + $0xe0] sm:$0xff] (!%p141_p2)   ;;  %v1935_v22 = vld [vmem:[%s2516_s1 + $0xe8] sm:$0xff] (!%p141_p2)  }
   0xb   : > { %v1928_v15 = vld [vmem:[%s2516_s1 + $0x18] sm:$0xff] (!%p141_p2)   ;;  %v1932_v19 = vld [vmem:[%s2516_s1 + $0x20] sm:$0xff] (!%p141_p2)   ;;  %v1936_v23 = vld [vmem:[%s2516_s1 + $0x28] sm:$0xff] (!%p141_p2)  }
   0xc   : > { %1694 = vmatpush3.bf16.msra.mxu0 (!%p141_p2), %v1920_v6  ;;  %v1929_v16 = vld [vmem:[%s2516_s1 + $0x98] sm:$0xff] (!%p141_p2)   ;;  %v1933_v20 = vld [vmem:[%s2516_s1 + $0xa0] sm:$0xff] (!%p141_p2)   ;;  %v1937_v24 = vld [vmem:[%s2516_s1 + $0xa8] sm:$0xff] (!%p141_p2)  }
   0xd   : > { %s2524_s13 = smov (!%p168_p3, %s1546_s13), 1  ;;  %1734 = vmatpush3.bf16.msra.mxu1 %v1921_v7  ;;  %1695 = vmatprep.subr.bf16.mxu0 %v1922_v8  ;;  %v1938_v25 = vld [vmem:[%s2516_s1 + $0x70] sm:$0xff]   ;;  %v1942_v29 = vld [vmem:[%s2516_s1 + $0x78] sm:$0xff]   ;;  %v1948_v53 = vld [vmem:[%s2516_s1 + $0x140] sm:$0xff]  }
   0xe   : > { %s1904_s26 = smul.u32 160, %s2524_s13  ;;  %1735 = vmatprep.subr.bf16.mxu1 %v1923_v10  ;;  %v1939_v26 = vld [vmem:[%s2516_s1 + $0xf0] sm:$0xff]   ;;  %v1943_v30 = vld [vmem:[%s2516_s1 + $0xf8] sm:$0xff]   ;;  %v1949_v54 = vld [vmem:[%s2516_s1 + $0x1c0] sm:$0xff]  }
   0xf   : > { %s1903_s21 = smul.u32 80, %s2524_s13  ;;  %v1940_v27 = vld [vmem:[%s2516_s1 + $0x30] sm:$0xff]   ;;  %v1944_v31 = vld [vmem:[%s2516_s1 + $0x38] sm:$0xff]   ;;  %vm2191_vm4 = vmor %vm334_vm0, %vm335_vm1 }
  0x10   : > { %s2062_s6 = scalar_lea.vmem %s2517_s2, %s1904_s26  ;;  %1696 = vmatpush3.bf16.msra.mxu0 %v1924_v11  ;;  %v1941_v28 = vld [vmem:[%s2516_s1 + $0xb0] sm:$0xff]   ;;  %v1945_v32 = vld [vmem:[%s2516_s1 + $0xb8] sm:$0xff]   ;;  %vm2197_vm5 = vmor %vm203_vm2, %vm204_vm3 }
  0x11   : > { %1430 = vst [vmem:[%s2062_s6] sm:$0xff] %v2003_v9  ;;  %1431 = vst [vmem:[%s2062_s6 + $0x8] sm:$0x3] %v2003_v9  ;;  %1736 = vmatpush3.bf16.msra.mxu1 %v1925_v12  ;;  %1697 = vmatprep.subr.bf16.mxu0 %v1926_v13  ;;  %s2154_s5 = scalar_lea.vmem %s2515_s0, %s1903_s21  ;;  %v1950_v8 = vld [vmem:[%s2516_s1 + $0x100] sm:$0xff]  }
  0x12   : > { %1663 = vst [vmem:[%s2062_s6 + $0x90] sm:$0xff] %v2003_v9  ;;  %1664 = vst [vmem:[%s2062_s6 + $0x98] sm:$0x3] %v2003_v9  ;;  %1737 = vmatprep.subr.bf16.mxu1 %v1927_v14  ;;  %v2163_v33 = vld [vmem:[%s2154_s5] sm:$0xf]  ;;  %v1952_v14 = vld [vmem:[%s2516_s1 + $0x148] sm:$0xff]  }
  0x13   : > { %1665 = vst [vmem:[%s2062_s6 + $0x10] sm:$0x1] %v2003_v9  ;;  %1666 = vst [vmem:[%s2062_s6 + $0x20] sm:$0x1] %v2003_v9  ;;  %v184_v34 = vld [vmem:[%s2154_s5 + $0x4] sm:$0x1] }
  0x14   : > { %1667 = vst [vmem:[%s2062_s6 + $0x30] sm:$0x1] %v2003_v9  ;;  %1668 = vst [vmem:[%s2062_s6 + $0x40] sm:$0x1] %v2003_v9  ;;  %1698 = vmatpush3.bf16.msra.mxu0 %v1928_v15  ;;  %v2167_v35 = vld [vmem:[%s2154_s5 + $0x8] sm:$0xf] }
  0x15   : > { %1669 = vst [vmem:[%s2062_s6 + $0x50] sm:$0x1] %v2003_v9  ;;  %1670 = vst [vmem:[%s2062_s6 + $0x60] sm:$0x1] %v2003_v9  ;;  %1738 = vmatpush3.bf16.msra.mxu1 %v1929_v16  ;;  %1699 = vmatprep.subr.bf16.mxu0 %v1930_v17  ;;  %v186_v36 = vld [vmem:[%s2154_s5 + $0xc] sm:$0x1]  ;;  %v1564_v12 = vcombine.low %v2163_v33, %v2167_v35 }
  0x16   : > { %1671 = vst [vmem:[%s2062_s6 + $0x70] sm:$0x1] %v2003_v9  ;;  %1672 = vst [vmem:[%s2062_s6 + $0x80] sm:$0x1] %v2003_v9  ;;  %1739 = vmatprep.subr.bf16.mxu1 %v1931_v18  ;;  %v2171_v37 = vld [vmem:[%s2154_s5 + $0x10] sm:$0xf] }
  0x17   : > { %1673 = vst [vmem:[%s2062_s6 + $0x19] sm:$0x1] %v2003_v9  ;;  %1674 = vst [vmem:[%s2062_s6 + $0x29] sm:$0x1] %v2003_v9  ;;  %v2174_v38 = vld [vmem:[%s2154_s5 + $0x14] sm:$0x1]  ;;  %v1576_v0 = vcombine.low %v2167_v35, %v2171_v37 }
  0x18   : > { %1675 = vst [vmem:[%s2062_s6 + $0x39] sm:$0x1] %v2003_v9  ;;  %1676 = vst [vmem:[%s2062_s6 + $0x49] sm:$0x1] %v2003_v9  ;;  %1700 = vmatpush3.bf16.msra.mxu0 %v1932_v19  ;;  %v207_v39 = vshrl.u32 %v2163_v33, 16  ;;  %v210_v40 = vshll.u32 %v2163_v33, 16 }
  0x19   : > { %1677 = vst [vmem:[%s2062_s6 + $0x59] sm:$0x1] %v2003_v9  ;;  %1678 = vst [vmem:[%s2062_s6 + $0x69] sm:$0x1] %v2003_v9  ;;  %1740 = vmatpush3.bf16.msra.mxu1 %v1933_v20  ;;  %1701 = vmatprep.subr.bf16.mxu0 %v1934_v21  ;;  %v216_v41 = vshll.u32 %v184_v34, 16  ;;  %v221_v42 = vshrl.u32 %v2167_v35, 16 }
  0x1a   : > { %1679 = vst [vmem:[%s2062_s6 + $0x79] sm:$0x1] %v2003_v9  ;;  %1680 = vst [vmem:[%s2062_s6 + $0x89] sm:$0x1] %v2003_v9  ;;  %1741 = vmatprep.subr.bf16.mxu1 %v1935_v22  ;;  %v224_v43 = vshll.u32 %v2167_v35, 16  ;;  %v230_v44 = vshll.u32 %v186_v36, 16  ;;  %1166 = vmatprep.mubr.bf16.mxu1 %v1576_v0 }
  0x1b   : > { %v209_v45 = vrot.slane %v207_v39, 4  ;;  %v212_v46 = vrot.slane %v210_v40, 5  ;;  %v235_v47 = vshrl.u32 %v2171_v37, 16  ;;  %v238_v48 = vshll.u32 %v2171_v37, 16  ;;  %v1951_v9 = vld [vmem:[%s2516_s1 + $0x180] sm:$0xff]   ;;  %v1953_v15 = vld [vmem:[%s2516_s1 + $0x1c8] sm:$0xff]  }
  0x1c   : > { %1702 = vmatpush3.bf16.msra.mxu0 %v1936_v23  ;;  %v218_v49 = vrot.slane %v216_v41, 5  ;;  %v223_v50 = vrot.slane %v221_v42, 4  ;;  %v226_v51 = vrot.slane %v224_v43, 5  ;;  %v232_v52 = vrot.slane %v230_v44, 5  ;;  %v1955_v21 = vld [vmem:[%s2516_s1 + $0x188] sm:$0xff]   ;;  %v1960_v40 = vld [vmem:[%s2516_s1 + $0x110] sm:$0xff]  }
  0x1d   : > { %1742 = vmatpush3.bf16.msra.mxu1 %v1937_v24  ;;  %1703 = vmatprep.subr.bf16.mxu0 %v1938_v25  ;;  %v213_v55 = vor.u32 %v212_v46, %v209_v45  ;;  %v237_v56 = vrot.slane %v235_v47, 4  ;;  %v240_v57 = vrot.slane %v238_v48, 5  ;;  %v244_v58 = vshll.u32 %v2174_v38, 16  ;;  %v1954_v22 = vld [vmem:[%s2516_s1 + $0x108] sm:$0xff]   ;;  %v189_v23 = vld [vmem:[%s2154_s5 + $0x18] sm:$0xf] }
  0x1e   : > { %1743 = vmatprep.subr.bf16.mxu1 %v1939_v26  ;;  %v227_v61 = vor.u32 %v226_v51, %v223_v50  ;;  %v339_v62 = vrot.slane %v184_v34, 5  ;;  %v343_v63 = vrot.slane %v186_v36, 5  ;;  %v1554_v2 = vrot.slane %v2163_v33, 9  ;;  %v190_v24 = vld [vmem:[%s2154_s5 + $0x1c] sm:$0x1]  ;;  %v1961_v44 = vld [vmem:[%s2516_s1 + $0x190] sm:$0xff]  }
  0x1f   : > { %v214_v1 = vrot.slane %v213_v55, 4  ;;  %v241_v4 = vor.u32 %v240_v57, %v237_v56  ;;  %v1555_v5 = vrot.slane %v2167_v35, 9  ;;  %v246_v11 = vrot.slane %v244_v58, 5  ;;  %v2244_v25 = vld [vmem:[%s2154_s5 + $0x20] sm:$0xf]  ;;  %v1962_v46 = vld [vmem:[%s2516_s1 + $0x158] sm:$0xff]  }
  0x20   : > { %1704 = vmatpush3.bf16.msra.mxu0 %v1940_v27  ;;  %v228_v3 = vrot.slane %v227_v61, 4  ;;  %v340_v7 = vsel %vm2191_vm4, %v1554_v2, %v339_v62  ;;  %v1556_v18 = vrot.slane %v2171_v37, 9  ;;  %v347_v19 = vrot.slane %v2174_v38, 5  ;;  %v1959_v38 = vld [vmem:[%s2516_s1 + $0x1d0] sm:$0xff]   ;;  %v1963_v50 = vld [vmem:[%s2516_s1 + $0x1d8] sm:$0xff]  }
  0x21   : > { %1744 = vmatpush3.bf16.msra.mxu1 %v1941_v28  ;;  %1705 = vmatprep.subr.bf16.mxu0 %v1942_v29  ;;  %v219_v6 = vsel %vm2197_vm5, %v214_v1, %v218_v49  ;;  %v2223_v13 = vsel %vm2191_vm4, %v1555_v5, %v343_v63  ;;  %v242_v20 = vrot.slane %v241_v4, 4  ;;  %v249_v26 = vshrl.u32 %v189_v23, 16  ;;  %v1964_v51 = vld [vmem:[%s2516_s1 + $0x118] sm:$0xff]   ;;  %v192_v58 = vld [vmem:[%s2154_s5 + $0x24] sm:$0x1] }
  0x22   : > { %1745 = vmatprep.subr.bf16.mxu1 %v1943_v30  ;;  %v2217_v10 = vsel %vm2197_vm5, %v228_v3, %v232_v52  ;;  %v1572_v17 = vcombine.low %v340_v7, %v2223_v13  ;;  %v252_v27 = vshll.u32 %v189_v23, 16  ;;  %v258_v28 = vshll.u32 %v190_v24, 16  ;;  %v1958_v30 = vld [vmem:[%s2516_s1 + $0x150] sm:$0xff]   ;;  %v1965_v55 = vld [vmem:[%s2516_s1 + $0x198] sm:$0xff]   ;;  %v193_v61 = vld [vmem:[%s2154_s5 + $0x28] sm:$0xf] }
  0x23   : > { %v1568_v16 = vcombine.low %v219_v6, %v2217_v10  ;;  %v1577_v29 = vcombine.low %v189_v23, %v2244_v25  ;;  %v351_v33 = vrot.slane %v190_v24, 5  ;;  %v251_v34 = vrot.slane %v249_v26, 4  ;;  %v194_v62 = vld [vmem:[%s2154_s5 + $0x2c] sm:$0x1]  ;;  %v2306_v3 = vld [vmem:[%s2154_s5 + $0x30] sm:$0xf] }
  0x24   : > { %1706 = vmatpush3.bf16.msra.mxu0 %v1944_v31  ;;  %v2252_v31 = vsel %vm2191_vm4, %v1556_v18, %v347_v19  ;;  %v254_v35 = vrot.slane %v252_v27, 5  ;;  %v260_v36 = vrot.slane %v258_v28, 5  ;;  %v263_v41 = vshrl.u32 %v2244_v25, 16  ;;  %v1970_v19 = vld [vmem:[%s2516_s1 + $0x120] sm:$0xff]   ;;  %v1972_v28 = vld [vmem:[%s2516_s1 + $0x168] sm:$0xff]  }
  0x25   : > { %1746 = vmatpush3.bf16.msra.mxu1 %v1945_v32  ;;  %1771 = vmatprep.subr.bf16.mxu0 %v1948_v53  ;;  %v1557_v32 = vrot.slane %v189_v23, 9  ;;  %v266_v45 = vshll.u32 %v2244_v25, 16  ;;  %v2278_v48 = vsel %vm2197_vm5, %v242_v20, %v246_v11  ;;  %v1558_v56 = vrot.slane %v2244_v25, 9 }
  0x26   : > { %1811 = vmatprep.subr.bf16.mxu1 %v1949_v54  ;;  %1101 = vmatprep.mubr.bf16.mxu0 %v1568_v16  ;;  %v255_v42 = vor.u32 %v254_v35, %v251_v34  ;;  %v265_v47 = vrot.slane %v263_v41, 4  ;;  %v2292_v54 = vcombine.low %v2171_v37, %v189_v23  ;;  %v272_v37 = vshll.u32 %v192_v58, 16  ;;  %v1974_v34 = vld [vmem:[%s2516_s1 + $0x128] sm:$0xff]   ;;  %v197_v41 = vld [vmem:[%s2154_s5 + $0x38] sm:$0xf] }
  0x27   : > { %1102 = vmatmul.mubr.bf16.vlgmr.msra.gmra.mrb[0].mxu0 %v1564_v12  ;;  %v2259_v39 = vsel %vm2191_vm4, %v1557_v32, %v351_v33  ;;  %v268_v52 = vrot.slane %v266_v45, 5  ;;  %v277_v0 = vshrl.u32 %v193_v61, 16  ;;  %v280_v1 = vshll.u32 %v193_v61, 16  ;;  %v1968_v12 = vld [vmem:[%s2516_s1 + $0x160] sm:$0xff]  }
  0x28   : > { %1167 = vmatmul.mubr.bf16.vlgmr.msra.gmra.mrb[0].mxu1 %v1572_v17  ;;  %1772 = vmatpush3.bf16.msra.mxu0 %v1950_v8  ;;  %v2267_v43 = vcombine.low %v2252_v31, %v2259_v39  ;;  %v256_v49 = vrot.slane %v255_v42, 4  ;;  %v286_v2 = vshll.u32 %v194_v62, 16  ;;  %v1578_v5 = vcombine.low %v193_v61, %v2306_v3  ;;  %v198_v42 = vld [vmem:[%s2154_s5 + $0x3c] sm:$0x1] }
  0x29   : > { %1812 = vmatpush3.bf16.msra.mxu1 %v1951_v9  ;;  %1773 = vmatprep.subr.bf16.mxu0 %v1952_v14  ;;  %v269_v63 = vor.u32 %v268_v52, %v265_v47  ;;  %v355_v6 = vrot.slane %v192_v58, 5  ;;  %v274_v7 = vrot.slane %v272_v37, 5  ;;  %v279_v8 = vrot.slane %v277_v0, 4  ;;  %v1969_v14 = vld [vmem:[%s2516_s1 + $0x1e0] sm:$0xff]  }
  0x2a   : > { %1813 = vmatprep.subr.bf16.mxu1 %v1953_v15  ;;  %1174 = vmatprep.mubr.bf16.mxu1 %v1577_v29  ;;  %v2289_v53 = vsel %vm2197_vm5, %v256_v49, %v260_v36  ;;  %v282_v9 = vrot.slane %v280_v1, 5  ;;  %v288_v11 = vrot.slane %v286_v2, 5  ;;  %v1559_v16 = vrot.slane %v193_v61, 9  ;;  %v1973_v29 = vld [vmem:[%s2516_s1 + $0x1e8] sm:$0xff]  }
  0x2b   : > { %v2300_v57 = vcombine.low %v2278_v48, %v2289_v53  ;;  %v270_v4 = vrot.slane %v269_v63, 4  ;;  %v2319_v15 = vsel %vm2191_vm4, %v1558_v56, %v355_v6  ;;  %v359_v17 = vrot.slane %v194_v62, 5  ;;  %v1978_v62 = vld [vmem:[%s2516_s1 + $0x170] sm:$0xff]  }
  0x2c   : > { %1774 = vmatpush3.bf16.msra.mxu0 %v1954_v22  ;;  %v283_v18 = vor.u32 %v282_v9, %v279_v8  ;;  %v291_v20 = vshrl.u32 %v2306_v3, 16  ;;  %v1971_v22 = vld [vmem:[%s2516_s1 + $0x1a0] sm:$0xff]   ;;  %v294_v23 = vshll.u32 %v2306_v3, 16  ;;  %v2352_v33 = vcombine.low %v2244_v25, %v193_v61  ;;  %v1979_v63 = vld [vmem:[%s2516_s1 + $0x1f0] sm:$0xff]  }
  0x2d   : > { %1814 = vmatpush3.bf16.msra.mxu1 %v1955_v21  ;;  %1775 = vmatprep.subr.bf16.mxu0 %v1958_v30  ;;  %v2327_v21 = vsel %vm2191_vm4, %v1559_v16, %v359_v17  ;;  %v2335_v24 = vsel %vm2197_vm5, %v270_v4, %v274_v7  ;;  %v1560_v25 = vrot.slane %v2306_v3, 9  ;;  %v308_v47 = vshll.u32 %v197_v41, 16  ;;  %v1981_v7 = vld [vmem:[%s2516_s1 + $0x1b0] sm:$0xff]  }
  0x2e   : > { %1815 = vmatprep.subr.bf16.mxu1 %v1959_v38  ;;  %1109 = vmatprep.mubr.bf16.mxu0 %v2300_v57  ;;  %v284_v26 = vrot.slane %v283_v18, 4  ;;  %v2339_v27 = vcombine.low %v2319_v15, %v2327_v21  ;;  %v293_v30 = vrot.slane %v291_v20, 4  ;;  %v296_v35 = vrot.slane %v294_v23, 5  ;;  %v1975_v38 = vld [vmem:[%s2516_s1 + $0x1a8] sm:$0xff]   ;;  %v1984_v18 = vld [vmem:[%s2516_s1 + $0x138] sm:$0xff]  }
  0x2f   : > { %1110 = vmatmul.mubr.bf16.gmra.mrb[4].mxu0 %v2292_v54  ;;  %v314_v49 = vshll.u32 %v198_v42, 16  ;;  %v310_v61 = vrot.slane %v308_v47, 5  ;;  %v1561_v0 = vrot.slane %v197_v41, 9  ;;  %v367_v1 = vrot.slane %v198_v42, 5  ;;  %v1985_v20 = vld [vmem:[%s2516_s1 + $0x1b8] sm:$0xff]  }
  0x30   : > { %1175 = vmatmul.mubr.bf16.gmra.mrb[4].mxu1 %v2267_v43  ;;  %1776 = vmatpush3.bf16.msra.mxu0 %v1960_v40  ;;  %v2349_v32 = vsel %vm2197_vm5, %v284_v26, %v288_v11  ;;  %v196_v40 = vld [vmem:[%s2154_s5 + $0x34] sm:$0x1]  ;;  %v2414_v17 = vcombine.low %v2306_v3, %v197_v41  ;;  %v1986_v3 = vld [vmem:[%s2516_s1 + $0x200] sm:$0xff]   ;;  %v1581_v42 = vcombine.low %v2289_v53, %v2335_v24 }
  0x31   : > { %1816 = vmatpush3.bf16.msra.mxu1 %v1961_v44  ;;  %1777 = vmatprep.subr.bf16.mxu0 %v1962_v46  ;;  %v2360_v36 = vcombine.low %v2335_v24, %v2349_v32  ;;  %v297_v44 = vor.u32 %v296_v35, %v293_v30  ;;  %v300_v45 = vshll.u32 %v196_v40, 16  ;;  %v305_v46 = vshrl.u32 %v197_v41, 16  ;;  %v200_v30 = vld [vmem:[%s2154_s5 + $0x44] sm:$0x1] }
  0x32   : > { %1817 = vmatprep.subr.bf16.mxu1 %v1963_v50  ;;  %1182 = vmatprep.mubr.bf16.mxu1 %v1578_v5  ;;  %v2371_v50 = vld [vmem:[%s2154_s5 + $0x40] sm:$0xf]  ;;  %v363_v52 = vrot.slane %v196_v40, 5  ;;  %v316_v4 = vrot.slane %v314_v49, 5  ;;  %v1980_v5 = vld [vmem:[%s2516_s1 + $0x130] sm:$0xff]   ;;  %v2390_v6 = vsel %vm2191_vm4, %v1561_v0, %v367_v1  ;;  %v1585_v35 = vcombine.low %v2259_v39, %v2319_v15  ;;  %v1989_v39 = vld [vmem:[%s2516_s1 + $0x218] sm:$0xff]  }
  0x33   : > { %1117 = vmatprep.mubr.bf16.mxu0 %v2360_v36  ;;  %v302_v56 = vrot.slane %v300_v45, 5  ;;  %v307_v58 = vrot.slane %v305_v46, 4  ;;  %v370_v23 = vshrl.u32 %v2371_v50, 16  ;;  %v373_v26 = vshll.u32 %v2371_v50, 16 }
  0x34   : > { %1778 = vmatpush3.bf16.msra.mxu0 %v1964_v51  ;;  %v1579_v51 = vcombine.low %v197_v41, %v2371_v50  ;;  %v2383_v37 = vsel %vm2191_vm4, %v1560_v25, %v363_v52  ;;  %v1562_v53 = vrot.slane %v2371_v50, 9  ;;  %v387_v24 = vrot.slane %v200_v30, 5 }
  0x35   : > { %1818 = vmatpush3.bf16.msra.mxu1 %v1965_v55  ;;  %1779 = vmatprep.subr.bf16.mxu0 %v1968_v12  ;;  %v298_v55 = vrot.slane %v297_v44, 4  ;;  %v311_v2 = vor.u32 %v310_v61, %v307_v58  ;;  %v2401_v11 = vcombine.low %v2383_v37, %v2390_v6  ;;  %v1982_v12 = vld [vmem:[%s2516_s1 + $0x178] sm:$0xff]   ;;  %v1586_v49 = vcombine.low %v2327_v21, %v2383_v37  ;;  %v1991_v21 = vld [vmem:[%s2516_s1 + $0x228] sm:$0xff]   ;;  %v1993_v61 = vld [vmem:[%s2516_s1 + $0x230] sm:$0xff]  }
  0x36   : > { %1819 = vmatprep.subr.bf16.mxu1 %v1969_v14  ;;  %v1983_v14 = vld [vmem:[%s2516_s1 + $0x1f8] sm:$0xff]  }
  0x37   : > { %1118 = vmatmul.mubr.bf16.gmra.mrb[8].mxu0 %v2352_v33  ;;  %v2397_v8 = vsel %vm2197_vm5, %v298_v55, %v302_v56  ;;  %v312_v9 = vrot.slane %v311_v2, 4  ;;  %v388_v55 = vsel %vm2191_vm4, %v1562_v53, %v387_v24  ;;  %v1994_v37 = vld [vmem:[%s2516_s1 + $0x238] sm:$0xff]  }
  0x38   : > { %1780 = vmatpush3.bf16.msra.mxu0 %v1970_v19  ;;  %1183 = vmatmul.mubr.bf16.gmra.mrb[8].mxu1 %v2339_v27  ;;  %v1582_v58 = vcombine.low %v2349_v32, %v2397_v8  ;;  %v1587_v60 = vcombine.low %v2390_v6, %v388_v55 }
  0x39   : > { %1820 = vmatpush3.bf16.msra.mxu1 %v1971_v22  ;;  %1781 = vmatprep.subr.bf16.mxu0 %v1972_v28  ;;  %v2411_v16 = vsel %vm2197_vm5, %v312_v9, %v316_v4  ;;  %v1584_v22 = vcombine.low %v2223_v13, %v2252_v31  ;;  %v1987_v13 = vld [vmem:[%s2516_s1 + $0x208] sm:$0xff]   ;;  %v372_v31 = vrot.slane %v370_v23, 4  ;;  %v1580_v28 = vcombine.low %v2217_v10, %v2278_v48  ;;  %v1988_v10 = vld [vmem:[%s2516_s1 + $0x210] sm:$0xff]  }
  0x3a   : > { %1821 = vmatprep.subr.bf16.mxu1 %v1973_v29  ;;  %1190 = vmatprep.mubr.bf16.mxu1 %v1579_v51  ;;  %v1571_v19 = vcombine.low %v2397_v8, %v2411_v16  ;;  %v2441_v29 = vld [vmem:[%s2154_s5 + $0x48] sm:$0xf]  ;;  %v1990_v51 = vld [vmem:[%s2516_s1 + $0x220] sm:$0xff]  }
  0x3b   : > { %v393_v25 = vshll.u32 %v2441_v29, 16  ;;  %v1563_v32 = vrot.slane %v2441_v29, 9 }
  0x3c   : > { %1782 = vmatpush3.bf16.msra.mxu0 %v1974_v34  ;;  %1125 = vmatprep.mubr.bf16.mxu0 %v1571_v19  ;;  %v2446_v34 = vld [vmem:[%s2154_s5 + $0x4c] sm:$0x1] }
  0x3d   : > { %1822 = vmatpush3.bf16.msra.mxu1 %v1975_v38  ;;  %1783 = vmatprep.subr.bf16.mxu0 %v1978_v62  ;;  %v390_v38 = vshrl.u32 %v2441_v29, 16  ;;  %v399_v41 = vshll.u32 %v2446_v34, 16  ;;  %v1588_v62 = vcombine.low %v2371_v50, %v2441_v29 }
  0x3e   : > { %1823 = vmatprep.subr.bf16.mxu1 %v1979_v63  ;;  %v407_v63 = vrot.slane %v2446_v34, 5 }
  0x3f   : > { %1126 = vmatmul.mubr.bf16.gmra.mrb[12].mxu0 %v2414_v17  ;;  %v392_v40 = vrot.slane %v390_v38, 4  ;;  %v401_v47 = vrot.slane %v399_v41, 5 }
  0x40   : > { %1784 = vmatpush3.bf16.msra.mxu0 %v1980_v5  ;;  %1191 = vmatmul.mubr.bf16.gmra.mrb[12].mxu1 %v2401_v11  ;;  %v408_v50 = vsel %vm2191_vm4, %v1563_v32, %v407_v63 }
  0x41   : > { %1824 = vmatpush3.bf16.msra.mxu1 %v1981_v7  ;;  %1785 = vmatprep.subr.bf16.mxu0 %v1982_v12  ;;  %v1590_v1 = vcombine.low %v388_v55, %v408_v50 }
  0x42   : > { %1825 = vmatprep.subr.bf16.mxu1 %v1983_v14  ;;  %1296 = vmatprep.mubr.bf16.mxu1 %v2300_v57  ;;  %v375_v57 = vrot.slane %v373_v26, 5 }
  0x43   : > { %1231 = vmatprep.mubr.bf16.mxu0 %v1584_v22 }
  0x44   : > { %1786 = vmatpush3.bf16.msra.mxu0 %v1984_v18  ;;  %v376_v48 = vor.u32 %v375_v57, %v372_v31 }
  0x45   : > { %1826 = vmatpush3.bf16.msra.mxu1 %v1985_v20  ;;  %1863 = vmatprep.subr.bf16.mxu0 %v1986_v3 }
  0x46   : > { %1887 = vmatprep.subr.bf16.mxu1 %v1986_v3  ;;  %v377_v44 = vrot.slane %v376_v48, 4 }
  0x47   : > { %1232 = vmatmul.mubr.bf16.vlgmr.msra.gmra.mrb[16].mxu0 %v1580_v28 }
  0x48   : > { %1297 = vmatmul.mubr.bf16.vlgmr.msra.gmra.mrb[16].mxu1 %v2292_v54  ;;  %v379_v54 = vshll.u32 %v200_v30, 16  ;;  %1864 = vmatpush3.bf16.msra.mxu0 %v1986_v3 }
  0x49   : > { %1895 = vmatpush3.bf16.msra.mxu1 %v1986_v3  ;;  %1304 = vmatprep.mubr.bf16.mxu1 %v2360_v36  ;;  %v395_v36 = vrot.slane %v393_v25, 5 }
  0x4a   : > { %1888 = vmatprep.subr.bf16.mxu1 %v1987_v13  ;;  %1865 = vmatprep.subr.bf16.mxu0 %v1987_v13  ;;  %v381_v45 = vrot.slane %v379_v54, 5 }
  0x4b   : > { %1239 = vmatprep.mubr.bf16.mxu0 %v1585_v35  ;;  %v396_v15 = vor.u32 %v395_v36, %v392_v40 }
  0x4c   : > { %1866 = vmatpush3.bf16.msra.mxu0 %v1987_v13 }
  0x4d   : > { %1896 = vmatpush3.bf16.msra.mxu1 %v1987_v13  ;;  %v397_v46 = vrot.slane %v396_v15, 4  ;;  %1867 = vmatprep.subr.bf16.mxu0 %v1988_v10 }
  0x4e   : > { %1889 = vmatprep.subr.bf16.mxu1 %v1988_v10 }
  0x4f   : > { %1240 = vmatmul.mubr.bf16.gmra.mrb[20].mxu0 %v1581_v42  ;;  %v402_v52 = vsel %vm2197_vm5, %v397_v46, %v401_v47 }
  0x50   : > { %1305 = vmatmul.mubr.bf16.gmra.mrb[20].mxu1 %v2352_v33  ;;  %v382_v33 = vsel %vm2197_vm5, %v377_v44, %v381_v45  ;;  %1868 = vmatpush3.bf16.msra.mxu0 %v1988_v10 }
  0x51   : > { %1897 = vmatpush3.bf16.msra.mxu1 %v1988_v10  ;;  %1312 = vmatprep.mubr.bf16.mxu1 %v1571_v19  ;;  %v1589_v56 = vcombine.low %v382_v33, %v402_v52  ;;  %v1583_v0 = vcombine.low %v2411_v16, %v382_v33 }
  0x52   : > { %1890 = vmatprep.subr.bf16.mxu1 %v1989_v39  ;;  %1869 = vmatprep.subr.bf16.mxu0 %v1989_v39 }
  0x53   : > { %1247 = vmatprep.mubr.bf16.mxu0 %v1586_v49 }
  0x54   : > { %1870 = vmatpush3.bf16.msra.mxu0 %v1989_v39 }
  0x55   : > { %1898 = vmatpush3.bf16.msra.mxu1 %v1989_v39  ;;  %1871 = vmatprep.subr.bf16.mxu0 %v1990_v51 }
  0x56   : > { %1891 = vmatprep.subr.bf16.mxu1 %v1990_v51 }
  0x57   : > { %1248 = vmatmul.mubr.bf16.gmra.mrb[24].mxu0 %v1582_v58 }
  0x58   : > { %1313 = vmatmul.mubr.bf16.gmra.mrb[24].mxu1 %v2414_v17  ;;  %1872 = vmatpush3.bf16.msra.mxu0 %v1990_v51 }
  0x59   : > { %1899 = vmatpush3.bf16.msra.mxu1 %v1990_v51  ;;  %1320 = vmatprep.mubr.bf16.mxu1 %v1589_v56 }
  0x5a   : > { %1892 = vmatprep.subr.bf16.mxu1 %v1991_v21  ;;  %1873 = vmatprep.subr.bf16.mxu0 %v1991_v21 }
  0x5b   : > { %1255 = vmatprep.mubr.bf16.mxu0 %v1587_v60 }
  0x5c   : > { %1874 = vmatpush3.bf16.msra.mxu0 %v1991_v21 }
  0x5d   : > { %1900 = vmatpush3.bf16.msra.mxu1 %v1991_v21  ;;  %1875 = vmatprep.subr.bf16.mxu0 %v1993_v61 }
  0x5e   : > { %1893 = vmatprep.subr.bf16.mxu1 %v1993_v61 }
  0x5f   : > { %1256 = vmatmul.mubr.bf16.gmra.mrb[28].mxu0 %v1583_v0 }
  0x60   : > { %1321 = vmatmul.mubr.bf16.gmra.mrb[28].mxu1 %v1588_v62  ;;  %1876 = vmatpush3.bf16.msra.mxu0 %v1993_v61 }
  0x61   : > { %1901 = vmatpush3.bf16.msra.mxu1 %v1993_v61  ;;  %1883 = vmatprep.mubr.bf16.mxu1 %v2401_v11 }
  0x62   : > { %1894 = vmatprep.subr.bf16.mxu1 %v1994_v37  ;;  %1877 = vmatprep.subr.bf16.mxu0 %v1994_v37 }
  0x63   : > { %1879 = vmatprep.mubr.bf16.mxu0 %v2267_v43 }
  0x64   : > { %1878 = vmatpush3.bf16.msra.mxu0 %v1994_v37 }
  0x65   : > { %1902 = vmatpush3.bf16.msra.mxu1 %v1994_v37 }
  0x67   : > { %1880 = vmatmul.mubr.bf16.vlgmr.msra.gmra.mrb[32].mxu0 %v2339_v27 }
  0x68   : > { %1884 = vmatmul.mubr.bf16.vlgmr.msra.gmra.mrb[32].mxu1 %v1590_v1 }
  0xfa   : > { %v1707_v4 = vpop.f32.mrb[0].mxu0 }
  0xfb   : > { %v1747_v2 = vpop.f32.mrb[0].mxu1  ;;  %v1708_v5 = vpop.f32.mrb[1].mxu0 }
  0xfc   : > { %v1748_v59 = vpop.f32.mrb[1].mxu1  ;;  %v1709_v8 = vadd.f32 %v1708_v5, %v1707_v4  ;;  %v1710_v9 = vpop.f32.mrb[2].mxu0 }
  0xfd   : > { %v1749_v6 = vadd.f32 %v1748_v59, %v1747_v2  ;;  %v1750_v7 = vpop.f32.mrb[2].mxu1  ;;  %v1711_v12 = vpop.f32.mrb[3].mxu0 }
  0xfe   : > { %v1751_v11 = vpop.f32.mrb[3].mxu1  ;;  %v1712_v17 = vadd.f32 %v1711_v12, %v1710_v9 }
  0xff   : > { %v1752_v14 = vadd.f32 %v1751_v11, %v1750_v7  ;;  %v1169_v16 = vadd.f32 %v1749_v6, %v1709_v8 }
 0x101   : > { %v1172_v18 = vadd.f32 %v1752_v14, %v1712_v17 }
 0x102   : > { %v1713_v23 = vpop.f32.mrb[4].mxu0 }
 0x103   : > { %v1753_v19 = vpop.f32.mrb[4].mxu1  ;;  %v1714_v26 = vpop.f32.mrb[5].mxu0 }
 0x104   : > { %v1754_v43 = vpop.f32.mrb[5].mxu1  ;;  %v1715_v13 = vadd.f32 %v1714_v26, %v1713_v23  ;;  %v1716_v31 = vpop.f32.mrb[6].mxu0 }
 0x105   : > { %v1755_v20 = vadd.f32 %v1754_v43, %v1753_v19  ;;  %v1756_v22 = vpop.f32.mrb[6].mxu1  ;;  %v1717_v57 = vpop.f32.mrb[7].mxu0 }
 0x106   : > { %v1757_v3 = vpop.f32.mrb[7].mxu1  ;;  %v1718_v29 = vadd.f32 %v1717_v57, %v1716_v31 }
 0x107   : > { %v1758_v27 = vadd.f32 %v1757_v3, %v1756_v22  ;;  %v1177_v28 = vadd.f32 %v1755_v20, %v1715_v13 }
 0x109   : > { %v1180_v30 = vadd.f32 %v1758_v27, %v1718_v29 }
 0x10a   : > { %v1719_v48 = vpop.f32.mrb[8].mxu0 }
 0x10b   : > { %v1759_v34 = vpop.f32.mrb[8].mxu1  ;;  %v1720_v40 = vpop.f32.mrb[9].mxu0 }
 0x10c   : > { %v1760_v35 = vpop.f32.mrb[9].mxu1  ;;  %v1721_v36 = vadd.f32 %v1720_v40, %v1719_v48  ;;  %v1722_v41 = vpop.f32.mrb[10].mxu0 }
 0x10d   : > { %v1761_v38 = vadd.f32 %v1760_v35, %v1759_v34  ;;  %v1762_v25 = vpop.f32.mrb[10].mxu1  ;;  %v1723_v39 = vpop.f32.mrb[11].mxu0 }
 0x10e   : > { %v1763_v10 = vpop.f32.mrb[11].mxu1  ;;  %v1724_v42 = vadd.f32 %v1723_v39, %v1722_v41 }
 0x10f   : > { %v1764_v54 = vadd.f32 %v1763_v10, %v1762_v25  ;;  %v1185_v15 = vadd.f32 %v1761_v38, %v1721_v36 }
 0x111   : > { %v1188_v44 = vadd.f32 %v1764_v54, %v1724_v42 }
 0x112   : > { %v1725_v53 = vpop.f32.mrb[12].mxu0 }
 0x113   : > { %v1765_v45 = vpop.f32.mrb[12].mxu1  ;;  %v1726_v33 = vpop.f32.mrb[13].mxu0 }
 0x114   : > { %v1766_v46 = vpop.f32.mrb[13].mxu1  ;;  %v1727_v52 = vadd.f32 %v1726_v33, %v1725_v53  ;;  %v1728_v21 = vpop.f32.mrb[14].mxu0 }
 0x115   : > { %v1767_v47 = vadd.f32 %v1766_v46, %v1765_v45  ;;  %v1768_v49 = vpop.f32.mrb[14].mxu1  ;;  %v1729_v55 = vpop.f32.mrb[15].mxu0 }
 0x116   : > { %v1769_v51 = vpop.f32.mrb[15].mxu1  ;;  %v1730_v58 = vadd.f32 %v1729_v55, %v1728_v21 }
 0x117   : > { %v1770_v24 = vadd.f32 %v1769_v51, %v1768_v49  ;;  %v1193_v56 = vadd.f32 %v1767_v47, %v1727_v52 }
 0x119   : > { %v1196_v62 = vadd.f32 %v1770_v24, %v1730_v58 }
 0x11a   : > { %v1787_v0 = vpop.f32.mrb[16].mxu0 }
 0x11b   : > { %v1827_v60 = vpop.f32.mrb[16].mxu1  ;;  %v1788_v1 = vpop.f32.mrb[17].mxu0 }
 0x11c   : > { %v1828_v61 = vpop.f32.mrb[17].mxu1  ;;  %v1789_v2 = vadd.f32 %v1788_v1, %v1787_v0  ;;  %v1790_v4 = vpop.f32.mrb[18].mxu0 }
 0x11d   : > { %v1829_v32 = vadd.f32 %v1828_v61, %v1827_v60  ;;  %v1830_v63 = vpop.f32.mrb[18].mxu1  ;;  %v1791_v59 = vpop.f32.mrb[19].mxu0 }
 0x11e   : > { %v1831_v37 = vpop.f32.mrb[19].mxu1  ;;  %v1234_v5 = vadd.f32 %v1789_v2, %v1169_v16  ;;  %v1792_v6 = vadd.f32 %v1791_v59, %v1790_v4 }
 0x11f   : > { %v1832_v50 = vadd.f32 %v1831_v37, %v1830_v63 }
 0x120   : > { %v1237_v9 = vadd.f32 %v1792_v6, %v1172_v18  ;;  %v1299_v14 = vadd.f32 %v1829_v32, %v1234_v5 }
 0x122   : > { %v1793_v19 = vpop.f32.mrb[20].mxu0  ;;  %v2497_v20 = vadd.f32 %v1832_v50, %v1237_v9 }
 0x123   : > { %v1833_v7 = vpop.f32.mrb[20].mxu1  ;;  %v1794_v22 = vpop.f32.mrb[21].mxu0 }
 0x124   : > { %v1834_v8 = vpop.f32.mrb[21].mxu1  ;;  %v1795_v3 = vadd.f32 %v1794_v22, %v1793_v19  ;;  %v1796_v27 = vpop.f32.mrb[22].mxu0 }
 0x125   : > { %v1835_v11 = vadd.f32 %v1834_v8, %v1833_v7  ;;  %v1836_v12 = vpop.f32.mrb[22].mxu1  ;;  %v1797_v23 = vpop.f32.mrb[23].mxu0 }
 0x126   : > { %v1837_v17 = vpop.f32.mrb[23].mxu1  ;;  %v1242_v26 = vadd.f32 %v1795_v3, %v1177_v28  ;;  %v1798_v13 = vadd.f32 %v1797_v23, %v1796_v27 }
 0x127   : > { %v1838_v43 = vadd.f32 %v1837_v17, %v1836_v12 }
 0x128   : > { %v1245_v57 = vadd.f32 %v1798_v13, %v1180_v30  ;;  %v1307_v18 = vadd.f32 %v1835_v11, %v1242_v26 }
 0x12a   : > { %v1799_v38 = vpop.f32.mrb[24].mxu0  ;;  %v1310_v10 = vadd.f32 %v1838_v43, %v1245_v57 }
 0x12b   : > { %v1839_v31 = vpop.f32.mrb[24].mxu1  ;;  %v1800_v48 = vpop.f32.mrb[25].mxu0 }
 0x12c   : > { %v1840_v16 = vpop.f32.mrb[25].mxu1  ;;  %v1801_v54 = vadd.f32 %v1800_v48, %v1799_v38  ;;  %v1802_v40 = vpop.f32.mrb[26].mxu0 }
 0x12d   : > { %v1841_v29 = vadd.f32 %v1840_v16, %v1839_v31  ;;  %v1842_v34 = vpop.f32.mrb[26].mxu1  ;;  %v1803_v36 = vpop.f32.mrb[27].mxu0 }
 0x12e   : > { %v1843_v35 = vpop.f32.mrb[27].mxu1  ;;  %v1250_v41 = vadd.f32 %v1801_v54, %v1185_v15  ;;  %v1804_v39 = vadd.f32 %v1803_v36, %v1802_v40 }
 0x12f   : > { %v1844_v25 = vadd.f32 %v1843_v35, %v1842_v34 }
 0x130   : > { %v1253_v28 = vadd.f32 %v1804_v39, %v1188_v44  ;;  %v1315_v49 = vadd.f32 %v1841_v29, %v1250_v41 }
 0x132   : > { %v1805_v51 = vpop.f32.mrb[28].mxu0  ;;  %v1318_v24 = vadd.f32 %v1844_v25, %v1253_v28 }
 0x133   : > { %v1845_v42 = vpop.f32.mrb[28].mxu1  ;;  %v1806_v33 = vpop.f32.mrb[29].mxu0 }
 0x134   : > { %v1846_v45 = vpop.f32.mrb[29].mxu1  ;;  %v1807_v52 = vadd.f32 %v1806_v33, %v1805_v51  ;;  %v1808_v21 = vpop.f32.mrb[30].mxu0 }
 0x135   : > { %v1847_v46 = vadd.f32 %v1846_v45, %v1845_v42  ;;  %v1848_v47 = vpop.f32.mrb[30].mxu1  ;;  %v1809_v55 = vpop.f32.mrb[31].mxu0 }
 0x136   : > { %v1849_v30 = vpop.f32.mrb[31].mxu1  ;;  %v1258_v58 = vadd.f32 %v1807_v52, %v1193_v56  ;;  %v1810_v60 = vadd.f32 %v1809_v55, %v1808_v21 }
 0x137   : > { %v1850_v53 = vadd.f32 %v1849_v30, %v1848_v47 }
 0x138   : > { %v1261_v32 = vadd.f32 %v1810_v60, %v1196_v62  ;;  %v1323_v44 = vadd.f32 %v1847_v46, %v1258_v58 }
 0x13a   : > { %v1881_v50 = vpop.f32.mrb[32].mxu0  ;;  %v1326_v2 = vadd.f32 %v1850_v53, %v1261_v32 }
 0x13b   : > { %v1885_v15 = vpop.f32.mrb[32].mxu1  ;;  %v1372_v56 = vadd.f32 %v1881_v50, %v1307_v18  ;;  %v1363_v59 = vpop.f32.mrb[33].mxu0 }
 0x13c   : > { %v1379_v61 = vpop.f32.mrb[33].mxu1  ;;  %v1388_v1 = vadd.f32 %v1885_v15, %v1323_v44  ;;  %v1364_v5 = vadd.f32 %v1363_v59, %v1299_v14  ;;  %v1882_v62 = vpop.f32.mrb[34].mxu0 }
 0x13d   : > { %v1380_v63 = vadd.f32 %v1379_v61, %v1315_v49  ;;  %v1886_v37 = vpop.f32.mrb[34].mxu1  ;;  %1683 = vst [vmem:[%s2062_s6 + $0x31] sm:$0xff] %v1372_v56  ;;  %v1375_v7 = vadd.f32 %v1882_v62, %v1310_v10  ;;  %v1366_v8 = vpop.f32.mrb[35].mxu0  ;;  %v1410_v19 = vmul.f32 %v1372_v56, %v1372_v56 }
 0x13e   : > { %v1382_v0 = vpop.f32.mrb[35].mxu1  ;;  %1687 = vst [vmem:[%s2062_s6 + $0x71] sm:$0xff] %v1388_v1  ;;  %v1391_v6 = vadd.f32 %v1886_v37, %v1326_v2  ;;  %1681 = vst [vmem:[%s2062_s6 + $0x11] sm:$0xff] %v1364_v5  ;;  %v1367_v9 = vadd.f32 %v1366_v8, %v2497_v20  ;;  %v1408_v11 = vmul.f32 %v1364_v5, %v1364_v5 }
 0x13f   : > { %1685 = vst [vmem:[%s2062_s6 + $0x51] sm:$0xff] %v1380_v63  ;;  %v1383_v4 = vadd.f32 %v1382_v0, %v1318_v24  ;;  %1684 = vst [vmem:[%s2062_s6 + $0x41] sm:$0xff] %v1375_v7  ;;  %v1411_v3 = vmul.f32 %v1375_v7, %v1375_v7  ;;  %v1412_v23 = vmul.f32 %v1380_v63, %v1380_v63 }
 0x140   : > { %1688 = vst [vmem:[%s2062_s6 + $0x81] sm:$0xff] %v1391_v6  ;;  %v1394_v12 = vadd.f32 %v1367_v9, %v1364_v5  ;;  %v1409_v17 = vmul.f32 %v1367_v9, %v1367_v9  ;;  %1682 = vst [vmem:[%s2062_s6 + $0x21] sm:$0xff] %v1367_v9  ;;  %v1414_v29 = vmul.f32 %v1388_v1, %v1388_v1 }
 0x141   : > { %1686 = vst [vmem:[%s2062_s6 + $0x61] sm:$0xff] %v1383_v4  ;;  %v1413_v16 = vmul.f32 %v1383_v4, %v1383_v4  ;;  %v1415_v18 = vmul.f32 %v1391_v6, %v1391_v6  ;;  %s1553_s6 = sshll.u32 %s2524_s13, 1 }
 0x142   : > { %v1395_v43 = vadd.f32 %v1394_v12, %v1372_v56  ;;  %v1416_v22 = vadd.f32 %v1409_v17, %v1408_v11  ;;  %s181_s25 = scalar_lea.vmem %s2518_s3, %s1553_s6 }
 0x144   : > { %v1417_v14 = vadd.f32 %v1416_v22, %v1410_v19  ;;  %v1396_v27 = vadd.f32 %v1395_v43, %v1375_v7 }
 0x146   : > { %v1397_v26 = vadd.f32 %v1396_v27, %v1380_v63  ;;  %v1418_v13 = vadd.f32 %v1417_v14, %v1411_v3 }
 0x148   : > { %v1398_v31 = vadd.f32 %v1397_v26, %v1383_v4  ;;  %v1419_v57 = vadd.f32 %v1418_v13, %v1412_v23 }
 0x14a   : > { %v1399_v20 = vadd.f32 %v1398_v31, %v1388_v1  ;;  %v1420_v34 = vadd.f32 %v1419_v57, %v1413_v16 }
 0x14c   : > { %v1400_v35 = vadd.f32 %v1399_v20, %v1391_v6  ;;  %v1421_v38 = vadd.f32 %v1420_v34, %v1414_v29 }
 0x14e   : > { %v1401_v25 = vrot.slane %v1400_v35, 4  ;;  %v1422_v10 = vadd.f32 %v1421_v38, %v1415_v18 }
 0x150   : > { %v1402_v48 = vadd.f32 %v1401_v25, %v1400_v35  ;;  %v1423_v54 = vrot.slane %v1422_v10, 4 }
 0x152   : > { %v1403_v40 = vrot.slane %v1402_v48, 2  ;;  %v1424_v36 = vadd.f32 %v1423_v54, %v1422_v10 }
 0x154   : > { %v1404_v41 = vadd.f32 %v1403_v40, %v1402_v48  ;;  %v1425_v39 = vrot.slane %v1424_v36, 2 }
 0x156   : > { %v1405_v42 = vrot.slane %v1404_v41, 1  ;;  %v1426_v45 = vadd.f32 %v1425_v39, %v1424_v36 }
 0x158   : > { %v1406_v28 = vadd.f32 %v1405_v42, %v1404_v41  ;;  %v1427_v46 = vrot.slane %v1426_v45, 1 }
 0x15a   : > { %1407 = vst [vmem:[%s181_s25] sm:$0x1] %v1406_v28  ;;  %v1428_v47 = vadd.f32 %v1427_v46, %v1426_v45 }
 0x15c   : > { %1429 = vst [vmem:[%s181_s25 + $0x1] sm:$0x1] %v1428_v47 }
 0x15d PF: > { %s14_s12 = sadd.s32 1, %s2001_s12  }
 0x15e   : > { %p11_p4 = scmp.ge.s32.totalorder %s14_s12, 4  }
 0x160   :  { %13 = sbr.rel (!%p11_p4) target bundleno = 1 (0x1), region = 72 }

</bundles_post_ra>
